<compile_context>
chip_gen: v6e
topology: v6e:2x2x1
jax: 0.10.0
libtpu: 0.0.40
codegen_flags: <defaults>
</compile_context>

<pallas_src>
import jax
import jax.numpy as jnp
from jax.experimental import pallas as pl
from jax.experimental.pallas import tpu as pltpu

F32 = jnp.float32
BF16 = jnp.bfloat16

_TAPS = tuple((dy, dx) for dy in range(3) for dx in range(3))


def make_bottleneck_kernel(stride, depthwise):
    """Fused Bottleneck kernel for a fixed (static) stride / grouping mode."""

    def kernel(x_ref, w1_ref, b1_ref, w2_ref, b2_ref, w3_ref, b3_ref,
               wd_ref, bd_ref, wse1_ref, wse2_ref, o_ref, *scratch):
        # x_ref : (1, H, W, Cin)   one image, channels-last (channels on lanes)
        # w1    : depthwise -> (1, Ch)        else (Cin, Ch)       [BN1 scale folded]
        # w2    : depthwise -> (9, 1, Ch)     else (9*Ch, Ch)      [BN2 scale folded]
        # w3    : (Ch, Cout)                                        [BN3 scale folded]
        # wd    : (Cin, Cout)                                       [BNd scale folded]
        # b*    : (1, C) folded BN biases (f32)
        # wse1  : (Cout, Cse), wse2: (Cse, Cout)   SE MLP (bf16)
        # o_ref : (1, Ho, Wo, Cout)
        if depthwise:
            pad_ref, = scratch                     # (H+2, W+2, Ch) f32
        else:
            pad_ref, col_ref = scratch             # + (Ho*Wo, 9*Ch) f32 im2col slab

        H, W, Cin = x_ref.shape[1], x_ref.shape[2], x_ref.shape[3]
        Ch = b1_ref.shape[1]
        Cout = w3_ref.shape[1]
        Ho, Wo = o_ref.shape[1], o_ref.shape[2]

        x = x_ref[0]                               # (H, W, Cin) f32
        xf = x.reshape(H * W, Cin)

        # ---- conv1 (grouped 1x1, BN1 scale folded) + bias + ReLU -------------
        if depthwise:
            # groups == Cin == Ch: the grouped 1x1 conv is a per-channel scale
            # (VPU broadcast multiply; MXU stays free for conv3 / shortcut).
            h1 = jnp.maximum(xf * w1_ref[...] + b1_ref[...], 0.0)        # (H*W, Ch)
        else:
            h1 = jnp.dot(xf.astype(BF16), w1_ref[...],
                         preferred_element_type=F32)
            h1 = jnp.maximum(h1 + b1_ref[...], 0.0)                       # (H*W, Ch)

        # ---- conv2 (grouped 3x3, stride, pad=1, BN2 scale folded) ------------
        # Zero ONLY the 1-pixel border; the interior is fully overwritten every
        # step.  NOTE: nothing below may ever write the border, or later grid
        # steps would read stale non-zero padding.
        zrow = jnp.zeros((1, W + 2, Ch), pad_ref.dtype)
        zcol = jnp.zeros((H + 2, 1, Ch), pad_ref.dtype)
        pad_ref[0:1, :, :] = zrow
        pad_ref[H + 1:H + 2, :, :] = zrow
        pad_ref[:, 0:1, :] = zcol
        pad_ref[:, W + 1:W + 2, :] = zcol
        pad_ref[1:H + 1, 1:W + 1, :] = h1.reshape(H, W, Ch).astype(pad_ref.dtype)

        def window(dy, dx):
            if stride == 1:
                win = pad_ref[dy:dy + Ho, dx:dx + Wo, :]
            else:
                # TODO(synk): for stride>1, compact once into scratch instead of
                # repeated strided value slicing (perf only; unused at stride=1).
                win = pad_ref[dy:dy + stride * (Ho - 1) + 1,
                              dx:dx + stride * (Wo - 1) + 1, :]
                win = win[::stride, ::stride, :]
            return win.reshape(Ho * Wo, Ch)

        if depthwise:
            # Depthwise 3x3 = 9 per-channel broadcast multiply-adds on the VPU;
            # accumulator seeded from tap 0 (no zero-init materialization).
            acc = window(0, 0) * w2_ref[0]
            for t, (dy, dx) in enumerate(_TAPS[1:], start=1):
                acc = acc + window(dy, dx) * w2_ref[t]
            h2 = jnp.maximum(acc + b2_ref[...], 0.0)                      # (Ho*Wo, Ch)
        else:
            # im2col: build the (Ho*Wo, 9*Ch) slab once, then one deep-K matmul.
            for t, (dy, dx) in enumerate(_TAPS):
                col_ref[:, t * Ch:(t + 1) * Ch] = window(dy, dx)
            h2 = jnp.dot(col_ref[...].astype(BF16), w2_ref[...],
                         preferred_element_type=F32)
            h2 = jnp.maximum(h2 + b2_ref[...], 0.0)                       # (Ho*Wo, Ch)

        # ---- conv3 (grouped 1x1, BN3 scale folded): residual branch pre-SE ---
        res = jnp.dot(h2.astype(BF16), w3_ref[...],
                      preferred_element_type=F32) + b3_ref[...]           # (Ho*Wo, Cout)

        # ---- shortcut: 1x1 conv (stride) + BN (scale folded) -----------------
        if stride == 1:
            xd = xf
        else:
            xd = x[::stride, ::stride, :].reshape(Ho * Wo, Cin)
        down = jnp.dot(xd.astype(BF16), wd_ref[...],
                       preferred_element_type=F32) + bd_ref[...]          # (Ho*Wo, Cout)

        # ---- SE (squeeze + excite) fused with residual add + final ReLU ------
        pooled = jnp.mean(res, axis=0, keepdims=True)                     # (1, Cout)
        e = jnp.maximum(jnp.dot(pooled.astype(BF16), wse1_ref[...],
                                preferred_element_type=F32), 0.0)
        scale = jax.nn.sigmoid(jnp.dot(e.astype(BF16), wse2_ref[...],
                                       preferred_element_type=F32))       # (1, Cout)

        out = jnp.maximum(res * scale + down, 0.0)                        # (Ho*Wo, Cout)
        o_ref[0] = out.reshape(Ho, Wo, Cout).astype(o_ref.dtype)

    return kernel


# --------------------------- parameter preprocessing ---------------------------

def _block_diag_dense(w, groups):
    """Grouped conv weight (C_out, C_in//groups) -> dense (C_in, C_out),
    transposed for right-multiplication x @ W."""
    c_out, cig = w.shape
    cog = c_out // groups
    c_in = cig * groups
    dense = jnp.zeros((c_out, c_in), w.dtype)
    for g in range(groups):
        dense = dense.at[g * cog:(g + 1) * cog, g * cig:(g + 1) * cig].set(
            w[g * cog:(g + 1) * cog])
    return dense.T


def _fold_bn(gamma, beta, mean, var, eps=1e-5):
    scale = gamma / jnp.sqrt(var + eps)
    bias = beta - mean * scale
    return scale.reshape(1, -1), bias.reshape(1, -1)


# --------------------------------- wrapper -------------------------------------

def bottleneck_forward(x_nchw, p, *, groups, stride=1):
    """x_nchw: (B, Cin, H, W) f32; p: dict of PyTorch-layout parameters."""
    B, Cin, H, W = x_nchw.shape
    Ch = p["w1"].shape[0]
    Cout = p["w3"].shape[0]
    Ho = (H - 1) // stride + 1
    Wo = (W - 1) // stride + 1
    depthwise = (groups == Cin) and (Ch == Cin)   # conv1 & conv2 are depthwise

    s1, b1 = _fold_bn(*p["bn1"])
    s2, b2 = _fold_bn(*p["bn2"])
    s3, b3 = _fold_bn(*p["bn3"])
    sd, bd = _fold_bn(*p["bnd"])

    # BN scales are folded into the conv weights here (per-output-channel
    # column scaling); biases stay separate and are added in the kernel.
    if depthwise:
        # Per-channel vectors; stay f32 (VPU path).
        w1 = (p["w1"][:, 0, 0, 0].reshape(1, Ch) * s1).astype(F32)          # (1, Ch)
        taps = [p["w2"][:, 0, dy, dx].reshape(1, Ch) * s2
                for dy in range(3) for dx in range(3)]
        w2 = jnp.stack(taps, axis=0).astype(F32)                             # (9, 1, Ch)
    else:
        # Dense block-diagonal forms, bf16 for the MXU.
        w1 = (_block_diag_dense(p["w1"][:, :, 0, 0], groups) * s1).astype(BF16)   # (Cin, Ch)
        taps = [_block_diag_dense(p["w2"][:, :, dy, dx], groups) * s2
                for dy in range(3) for dx in range(3)]
        w2 = jnp.concatenate(taps, axis=0).astype(BF16)                           # (9*Ch, Ch)

    w3 = (_block_diag_dense(p["w3"][:, :, 0, 0], groups) * s3).astype(BF16)  # (Ch, Cout)
    wd = (p["wd"][:, :, 0, 0].T * sd).astype(BF16)                           # (Cin, Cout)
    wse1 = p["se_w1"].T.astype(BF16)                                         # (Cout, Cse)
    wse2 = p["se_w2"].T.astype(BF16)                                         # (Cse, Cout)

    x_nhwc = jnp.transpose(x_nchw, (0, 2, 3, 1))            # channels-last

    def _inv(a):  # grid-invariant (resident) operand
        nd = a.ndim
        return pl.BlockSpec(a.shape, lambda b, nd=nd: (0,) * nd)

    scratch = [pltpu.VMEM((H + 2, W + 2, Ch), F32)]
    if not depthwise:
        scratch.append(pltpu.VMEM((Ho * Wo, 9 * Ch), F32))  # im2col slab

    out_nhwc = pl.pallas_call(
        make_bottleneck_kernel(stride, depthwise),
        out_shape=jax.ShapeDtypeStruct((B, Ho, Wo, Cout), jnp.float32),
        grid=(B,),
        in_specs=[
            pl.BlockSpec((1, H, W, Cin), lambda b: (b, 0, 0, 0)),
            _inv(w1), _inv(b1), _inv(w2), _inv(b2),
            _inv(w3), _inv(b3), _inv(wd), _inv(bd),
            _inv(wse1), _inv(wse2),
        ],
        out_specs=pl.BlockSpec((1, Ho, Wo, Cout), lambda b: (b, 0, 0, 0)),
        scratch_shapes=scratch,
        compiler_params=pltpu.CompilerParams(
            dimension_semantics=("parallel",),
            vmem_limit_bytes=32 * 1024 * 1024),
    )(x_nhwc, w1, b1, w2, b2, w3, b3, wd, bd, wse1, wse2)

    return jnp.transpose(out_nhwc, (0, 3, 1, 2))            # back to NCHW


# ------------------------------ pure-JAX reference ------------------------------

def bottleneck_ref(x, p, *, groups, stride=1, eps=1e-5):
    HIGH = jax.lax.Precision.HIGHEST

    def conv(t, w, s, pad, g):
        return jax.lax.conv_general_dilated(
            t, w, window_strides=(s, s), padding=[(pad, pad), (pad, pad)],
            dimension_numbers=("NCHW", "OIHW", "NCHW"),
            feature_group_count=g, precision=HIGH)

    def bn(t, params):
        gamma, beta, mean, var = params
        scale = gamma / jnp.sqrt(var + eps)
        bias = beta - mean * scale
        return t * scale[None, :, None, None] + bias[None, :, None, None]

    relu = lambda t: jnp.maximum(t, 0.0)

    h = relu(bn(conv(x, p["w1"], 1, 0, groups), p["bn1"]))
    h = relu(bn(conv(h, p["w2"], stride, 1, groups), p["bn2"]))
    res = bn(conv(h, p["w3"], 1, 0, groups), p["bn3"])

    pooled = jnp.mean(res, axis=(2, 3))                                   # (B, Cout)
    e = relu(jnp.dot(pooled, p["se_w1"].T, precision=HIGH))
    sc = jax.nn.sigmoid(jnp.dot(e, p["se_w2"].T, precision=HIGH))
    res = res * sc[:, :, None, None]

    down = bn(conv(x, p["wd"], stride, 0, 1), p["bnd"])
    return relu(res + down)


# ----------------------------------- demo --------------------------------------

if __name__ == "__main__":

    def run_case(case_id, B, Cin, hidden, groups, H, W, stride=1):
        Cout = 2 * hidden
        Cse = Cout // 16                      # SELayer(2*hidden, reduction=16)

        key = jax.random.fold_in(jax.random.PRNGKey(0), case_id)
        ks = jax.random.split(key, 11)

        def normal(k, shape, s=0.2):
            return s * jax.random.normal(k, shape, dtype=jnp.float32)

        def bn_params(k, c):
            k1, k2, k3, k4 = jax.random.split(k, 4)
            gamma = 1.0 + 0.1 * jax.random.normal(k1, (c,), jnp.float32)
            beta = 0.1 * jax.random.normal(k2, (c,), jnp.float32)
            mean = 0.1 * jax.random.normal(k3, (c,), jnp.float32)
            var = jax.random.uniform(k4, (c,), jnp.float32, 0.5, 1.5)
            return gamma, beta, mean, var

        x = jax.random.normal(ks[0], (B, Cin, H, W), dtype=jnp.float32)
        params = {
            "w1": normal(ks[1], (hidden, Cin // groups, 1, 1)),
            "bn1": bn_params(ks[2], hidden),
            "w2": normal(ks[3], (hidden, hidden // groups, 3, 3)),
            "bn2": bn_params(ks[4], hidden),
            "w3": normal(ks[5], (Cout, hidden // groups, 1, 1)),
            "bn3": bn_params(ks[6], Cout),
            "wd": normal(ks[7], (Cout, Cin, 1, 1)),
            "bnd": bn_params(ks[8], Cout),
            "se_w1": normal(ks[9], (Cse, Cout), 0.5),   # PyTorch Linear layout (out, in)
            "se_w2": normal(ks[10], (Cout, Cse), 0.5),
        }

        out = bottleneck_forward(x, params, groups=groups, stride=stride)
        out = jax.block_until_ready(out)
        ref = bottleneck_ref(x, params, groups=groups, stride=stride)

        Ho = (H - 1) // stride + 1
        Wo = (W - 1) // stride + 1
        assert out.shape == ref.shape == (B, Cout, Ho, Wo)
        # Tolerance sized to bf16 MXU operands (f32 accumulation) vs an f32
        # HIGHEST-precision reference: worst-case ~K * 2^-9 relative on K<=64
        # contractions, i.e. ~1e-2; structural errors would be far larger.
        assert jnp.allclose(out, ref, rtol=2e-2, atol=2e-2), \
            "mismatch vs reference (case %d)" % case_id

    # Case 0: module-default style config (groups == channels): exercises the
    # depthwise VPU fast path for conv1 / conv2.
    run_case(0, B=2, Cin=32, hidden=32, groups=32, H=16, W=16, stride=1)
    # Case 1: general grouped config (2 channels per group): exercises the
    # dense block-diagonal + single im2col matmul path; Cout = 128 so output
    # stores are lane-dense.
    run_case(1, B=2, Cin=64, hidden=64, groups=32, H=16, W=16, stride=1)

    print("KERNEL_OK")
</pallas_src>

<mosaic_0001>
module attributes {stable_mosaic.version = 11 : i64} {
  func.func @kernel(%arg0: i32, %arg1: memref<1x16x16x32xf32, #tpu.memory_space<vmem>>, %arg2: memref<1x32xf32, #tpu.memory_space<vmem>>, %arg3: memref<1x32xf32, #tpu.memory_space<vmem>>, %arg4: memref<9x1x32xf32, #tpu.memory_space<vmem>>, %arg5: memref<1x32xf32, #tpu.memory_space<vmem>>, %arg6: memref<32x64xbf16, #tpu.memory_space<vmem>>, %arg7: memref<1x64xf32, #tpu.memory_space<vmem>>, %arg8: memref<32x64xbf16, #tpu.memory_space<vmem>>, %arg9: memref<1x64xf32, #tpu.memory_space<vmem>>, %arg10: memref<64x4xbf16, #tpu.memory_space<vmem>>, %arg11: memref<4x64xbf16, #tpu.memory_space<vmem>>, %arg12: memref<1x16x16x64xf32, #tpu.memory_space<vmem>>, %arg13: memref<18x18x32xf32, #tpu.memory_space<vmem>>) attributes {dimension_semantics = [#tpu.dimension_semantics<parallel>], iteration_bounds = array<i64: 2>, scalar_prefetch = 0 : i64, scratch_operands = 1 : i64, tpu.core_type = #tpu.core_type<tc>, window_params = [{transform_indices = @transform_0, window_bounds = array<i64: 1, 16, 16, 32>}, {pipeline_mode = #tpu.pipeline_mode<synchronous>, transform_indices = @transform_1, window_bounds = array<i64: 1, 32>}, {pipeline_mode = #tpu.pipeline_mode<synchronous>, transform_indices = @transform_2, window_bounds = array<i64: 1, 32>}, {pipeline_mode = #tpu.pipeline_mode<synchronous>, transform_indices = @transform_3, window_bounds = array<i64: 9, 1, 32>}, {pipeline_mode = #tpu.pipeline_mode<synchronous>, transform_indices = @transform_4, window_bounds = array<i64: 1, 32>}, {pipeline_mode = #tpu.pipeline_mode<synchronous>, transform_indices = @transform_5, window_bounds = array<i64: 32, 64>}, {pipeline_mode = #tpu.pipeline_mode<synchronous>, transform_indices = @transform_6, window_bounds = array<i64: 1, 64>}, {pipeline_mode = #tpu.pipeline_mode<synchronous>, transform_indices = @transform_7, window_bounds = array<i64: 32, 64>}, {pipeline_mode = #tpu.pipeline_mode<synchronous>, transform_indices = @transform_8, window_bounds = array<i64: 1, 64>}, {pipeline_mode = #tpu.pipeline_mode<synchronous>, transform_indices = @transform_9, window_bounds = array<i64: 64, 4>}, {pipeline_mode = #tpu.pipeline_mode<synchronous>, transform_indices = @transform_10, window_bounds = array<i64: 4, 64>}, {transform_indices = @transform_11, window_bounds = array<i64: 1, 16, 16, 64>}]} {
    %c0 = arith.constant 0 : index
    %c0_0 = arith.constant 0 : index
    %c0_1 = arith.constant 0 : index
    %c0_2 = arith.constant 0 : index
    %0 = vector.load %arg1[%c0, %c0_0, %c0_1, %c0_2] : memref<1x16x16x32xf32, #tpu.memory_space<vmem>>, vector<1x16x16x32xf32>
    %1 = vector.shape_cast %0 : vector<1x16x16x32xf32> to vector<16x16x32xf32>
    %2 = vector.shape_cast %1 : vector<16x16x32xf32> to vector<256x32xf32>
    %c0_3 = arith.constant 0 : index
    %c0_4 = arith.constant 0 : index
    %3 = vector.load %arg2[%c0_3, %c0_4] : memref<1x32xf32, #tpu.memory_space<vmem>>, vector<1x32xf32>
    %4 = vector.broadcast %3 : vector<1x32xf32> to vector<256x32xf32>
    %5 = arith.mulf %2, %4 : vector<256x32xf32>
    %c0_5 = arith.constant 0 : index
    %c0_6 = arith.constant 0 : index
    %6 = vector.load %arg3[%c0_5, %c0_6] : memref<1x32xf32, #tpu.memory_space<vmem>>, vector<1x32xf32>
    %7 = vector.broadcast %6 : vector<1x32xf32> to vector<256x32xf32>
    %8 = arith.addf %5, %7 : vector<256x32xf32>
    %cst = arith.constant 0.000000e+00 : f32
    %9 = vector.broadcast %cst : f32 to vector<256x32xf32>
    %10 = arith.maximumf %8, %9 : vector<256x32xf32>
    %cst_7 = arith.constant 0.000000e+00 : f32
    %11 = vector.broadcast %cst_7 : f32 to vector<1x18x32xf32>
    %cst_8 = arith.constant 0.000000e+00 : f32
    %12 = vector.broadcast %cst_8 : f32 to vector<18x1x32xf32>
    %c0_9 = arith.constant 0 : index
    %c0_10 = arith.constant 0 : index
    %c0_11 = arith.constant 0 : index
    %13 = vector.load %arg13[%c0_9, %c0_10, %c0_11] : memref<18x18x32xf32, #tpu.memory_space<vmem>>, vector<1x18x32xf32>
    tpu.vector_store %arg13[%c0_9, %c0_10, %c0_11], %11 {strides = array<i32>} : memref<18x18x32xf32, #tpu.memory_space<vmem>>, vector<1x18x32xf32>,
    %c17 = arith.constant 17 : index
    %c0_12 = arith.constant 0 : index
    %c0_13 = arith.constant 0 : index
    %14 = vector.load %arg13[%c17, %c0_12, %c0_13] : memref<18x18x32xf32, #tpu.memory_space<vmem>>, vector<1x18x32xf32>
    tpu.vector_store %arg13[%c17, %c0_12, %c0_13], %11 {strides = array<i32>} : memref<18x18x32xf32, #tpu.memory_space<vmem>>, vector<1x18x32xf32>,
    %c0_14 = arith.constant 0 : index
    %c0_15 = arith.constant 0 : index
    %c0_16 = arith.constant 0 : index
    %15 = vector.load %arg13[%c0_14, %c0_15, %c0_16] : memref<18x18x32xf32, #tpu.memory_space<vmem>>, vector<18x1x32xf32>
    tpu.vector_store %arg13[%c0_14, %c0_15, %c0_16], %12 {strides = array<i32>} : memref<18x18x32xf32, #tpu.memory_space<vmem>>, vector<18x1x32xf32>,
    %c0_17 = arith.constant 0 : index
    %c17_18 = arith.constant 17 : index
    %c0_19 = arith.constant 0 : index
    %16 = vector.load %arg13[%c0_17, %c17_18, %c0_19] : memref<18x18x32xf32, #tpu.memory_space<vmem>>, vector<18x1x32xf32>
    tpu.vector_store %arg13[%c0_17, %c17_18, %c0_19], %12 {strides = array<i32>} : memref<18x18x32xf32, #tpu.memory_space<vmem>>, vector<18x1x32xf32>,
    %17 = vector.shape_cast %10 : vector<256x32xf32> to vector<16x16x32xf32>
    %c1 = arith.constant 1 : index
    %c1_20 = arith.constant 1 : index
    %c0_21 = arith.constant 0 : index
    %18 = vector.load %arg13[%c1, %c1_20, %c0_21] : memref<18x18x32xf32, #tpu.memory_space<vmem>>, vector<16x16x32xf32>
    tpu.vector_store %arg13[%c1, %c1_20, %c0_21], %17 {strides = array<i32>} : memref<18x18x32xf32, #tpu.memory_space<vmem>>, vector<16x16x32xf32>,
    %c0_22 = arith.constant 0 : index
    %c0_23 = arith.constant 0 : index
    %c0_24 = arith.constant 0 : index
    %19 = vector.load %arg13[%c0_22, %c0_23, %c0_24] : memref<18x18x32xf32, #tpu.memory_space<vmem>>, vector<16x16x32xf32>
    %20 = vector.shape_cast %19 : vector<16x16x32xf32> to vector<256x32xf32>
    %c0_25 = arith.constant 0 : index
    %c0_26 = arith.constant 0 : index
    %c0_27 = arith.constant 0 : index
    %21 = vector.load %arg4[%c0_25, %c0_26, %c0_27] : memref<9x1x32xf32, #tpu.memory_space<vmem>>, vector<1x1x32xf32>
    %22 = vector.shape_cast %21 : vector<1x1x32xf32> to vector<1x32xf32>
    %23 = vector.broadcast %22 : vector<1x32xf32> to vector<256x32xf32>
    %24 = arith.mulf %20, %23 : vector<256x32xf32>
    %c0_28 = arith.constant 0 : index
    %c1_29 = arith.constant 1 : index
    %c0_30 = arith.constant 0 : index
    %25 = vector.load %arg13[%c0_28, %c1_29, %c0_30] : memref<18x18x32xf32, #tpu.memory_space<vmem>>, vector<16x16x32xf32>
    %26 = vector.shape_cast %25 : vector<16x16x32xf32> to vector<256x32xf32>
    %c1_31 = arith.constant 1 : index
    %c0_32 = arith.constant 0 : index
    %c0_33 = arith.constant 0 : index
    %27 = vector.load %arg4[%c1_31, %c0_32, %c0_33] : memref<9x1x32xf32, #tpu.memory_space<vmem>>, vector<1x1x32xf32>
    %28 = vector.shape_cast %27 : vector<1x1x32xf32> to vector<1x32xf32>
    %29 = vector.broadcast %28 : vector<1x32xf32> to vector<256x32xf32>
    %30 = arith.mulf %26, %29 : vector<256x32xf32>
    %31 = arith.addf %24, %30 : vector<256x32xf32>
    %c0_34 = arith.constant 0 : index
    %c2 = arith.constant 2 : index
    %c0_35 = arith.constant 0 : index
    %32 = vector.load %arg13[%c0_34, %c2, %c0_35] : memref<18x18x32xf32, #tpu.memory_space<vmem>>, vector<16x16x32xf32>
    %33 = vector.shape_cast %32 : vector<16x16x32xf32> to vector<256x32xf32>
    %c2_36 = arith.constant 2 : index
    %c0_37 = arith.constant 0 : index
    %c0_38 = arith.constant 0 : index
    %34 = vector.load %arg4[%c2_36, %c0_37, %c0_38] : memref<9x1x32xf32, #tpu.memory_space<vmem>>, vector<1x1x32xf32>
    %35 = vector.shape_cast %34 : vector<1x1x32xf32> to vector<1x32xf32>
    %36 = vector.broadcast %35 : vector<1x32xf32> to vector<256x32xf32>
    %37 = arith.mulf %33, %36 : vector<256x32xf32>
    %38 = arith.addf %31, %37 : vector<256x32xf32>
    %c1_39 = arith.constant 1 : index
    %c0_40 = arith.constant 0 : index
    %c0_41 = arith.constant 0 : index
    %39 = vector.load %arg13[%c1_39, %c0_40, %c0_41] : memref<18x18x32xf32, #tpu.memory_space<vmem>>, vector<16x16x32xf32>
    %40 = vector.shape_cast %39 : vector<16x16x32xf32> to vector<256x32xf32>
    %c3 = arith.constant 3 : index
    %c0_42 = arith.constant 0 : index
    %c0_43 = arith.constant 0 : index
    %41 = vector.load %arg4[%c3, %c0_42, %c0_43] : memref<9x1x32xf32, #tpu.memory_space<vmem>>, vector<1x1x32xf32>
    %42 = vector.shape_cast %41 : vector<1x1x32xf32> to vector<1x32xf32>
    %43 = vector.broadcast %42 : vector<1x32xf32> to vector<256x32xf32>
    %44 = arith.mulf %40, %43 : vector<256x32xf32>
    %45 = arith.addf %38, %44 : vector<256x32xf32>
    %c1_44 = arith.constant 1 : index
    %c1_45 = arith.constant 1 : index
    %c0_46 = arith.constant 0 : index
    %46 = vector.load %arg13[%c1_44, %c1_45, %c0_46] : memref<18x18x32xf32, #tpu.memory_space<vmem>>, vector<16x16x32xf32>
    %47 = vector.shape_cast %46 : vector<16x16x32xf32> to vector<256x32xf32>
    %c4 = arith.constant 4 : index
    %c0_47 = arith.constant 0 : index
    %c0_48 = arith.constant 0 : index
    %48 = vector.load %arg4[%c4, %c0_47, %c0_48] : memref<9x1x32xf32, #tpu.memory_space<vmem>>, vector<1x1x32xf32>
    %49 = vector.shape_cast %48 : vector<1x1x32xf32> to vector<1x32xf32>
    %50 = vector.broadcast %49 : vector<1x32xf32> to vector<256x32xf32>
    %51 = arith.mulf %47, %50 : vector<256x32xf32>
    %52 = arith.addf %45, %51 : vector<256x32xf32>
    %c1_49 = arith.constant 1 : index
    %c2_50 = arith.constant 2 : index
    %c0_51 = arith.constant 0 : index
    %53 = vector.load %arg13[%c1_49, %c2_50, %c0_51] : memref<18x18x32xf32, #tpu.memory_space<vmem>>, vector<16x16x32xf32>
    %54 = vector.shape_cast %53 : vector<16x16x32xf32> to vector<256x32xf32>
    %c5 = arith.constant 5 : index
    %c0_52 = arith.constant 0 : index
    %c0_53 = arith.constant 0 : index
    %55 = vector.load %arg4[%c5, %c0_52, %c0_53] : memref<9x1x32xf32, #tpu.memory_space<vmem>>, vector<1x1x32xf32>
    %56 = vector.shape_cast %55 : vector<1x1x32xf32> to vector<1x32xf32>
    %57 = vector.broadcast %56 : vector<1x32xf32> to vector<256x32xf32>
    %58 = arith.mulf %54, %57 : vector<256x32xf32>
    %59 = arith.addf %52, %58 : vector<256x32xf32>
    %c2_54 = arith.constant 2 : index
    %c0_55 = arith.constant 0 : index
    %c0_56 = arith.constant 0 : index
    %60 = vector.load %arg13[%c2_54, %c0_55, %c0_56] : memref<18x18x32xf32, #tpu.memory_space<vmem>>, vector<16x16x32xf32>
    %61 = vector.shape_cast %60 : vector<16x16x32xf32> to vector<256x32xf32>
    %c6 = arith.constant 6 : index
    %c0_57 = arith.constant 0 : index
    %c0_58 = arith.constant 0 : index
    %62 = vector.load %arg4[%c6, %c0_57, %c0_58] : memref<9x1x32xf32, #tpu.memory_space<vmem>>, vector<1x1x32xf32>
    %63 = vector.shape_cast %62 : vector<1x1x32xf32> to vector<1x32xf32>
    %64 = vector.broadcast %63 : vector<1x32xf32> to vector<256x32xf32>
    %65 = arith.mulf %61, %64 : vector<256x32xf32>
    %66 = arith.addf %59, %65 : vector<256x32xf32>
    %c2_59 = arith.constant 2 : index
    %c1_60 = arith.constant 1 : index
    %c0_61 = arith.constant 0 : index
    %67 = vector.load %arg13[%c2_59, %c1_60, %c0_61] : memref<18x18x32xf32, #tpu.memory_space<vmem>>, vector<16x16x32xf32>
    %68 = vector.shape_cast %67 : vector<16x16x32xf32> to vector<256x32xf32>
    %c7 = arith.constant 7 : index
    %c0_62 = arith.constant 0 : index
    %c0_63 = arith.constant 0 : index
    %69 = vector.load %arg4[%c7, %c0_62, %c0_63] : memref<9x1x32xf32, #tpu.memory_space<vmem>>, vector<1x1x32xf32>
    %70 = vector.shape_cast %69 : vector<1x1x32xf32> to vector<1x32xf32>
    %71 = vector.broadcast %70 : vector<1x32xf32> to vector<256x32xf32>
    %72 = arith.mulf %68, %71 : vector<256x32xf32>
    %73 = arith.addf %66, %72 : vector<256x32xf32>
    %c2_64 = arith.constant 2 : index
    %c2_65 = arith.constant 2 : index
    %c0_66 = arith.constant 0 : index
    %74 = vector.load %arg13[%c2_64, %c2_65, %c0_66] : memref<18x18x32xf32, #tpu.memory_space<vmem>>, vector<16x16x32xf32>
    %75 = vector.shape_cast %74 : vector<16x16x32xf32> to vector<256x32xf32>
    %c8 = arith.constant 8 : index
    %c0_67 = arith.constant 0 : index
    %c0_68 = arith.constant 0 : index
    %76 = vector.load %arg4[%c8, %c0_67, %c0_68] : memref<9x1x32xf32, #tpu.memory_space<vmem>>, vector<1x1x32xf32>
    %77 = vector.shape_cast %76 : vector<1x1x32xf32> to vector<1x32xf32>
    %78 = vector.broadcast %77 : vector<1x32xf32> to vector<256x32xf32>
    %79 = arith.mulf %75, %78 : vector<256x32xf32>
    %80 = arith.addf %73, %79 : vector<256x32xf32>
    %c0_69 = arith.constant 0 : index
    %c0_70 = arith.constant 0 : index
    %81 = vector.load %arg5[%c0_69, %c0_70] : memref<1x32xf32, #tpu.memory_space<vmem>>, vector<1x32xf32>
    %82 = vector.broadcast %81 : vector<1x32xf32> to vector<256x32xf32>
    %83 = arith.addf %80, %82 : vector<256x32xf32>
    %cst_71 = arith.constant 0.000000e+00 : f32
    %84 = vector.broadcast %cst_71 : f32 to vector<256x32xf32>
    %85 = arith.maximumf %83, %84 : vector<256x32xf32>
    %86 = arith.truncf %85 : vector<256x32xf32> to vector<256x32xbf16>
    %c0_72 = arith.constant 0 : index
    %c0_73 = arith.constant 0 : index
    %87 = vector.load %arg6[%c0_72, %c0_73] : memref<32x64xbf16, #tpu.memory_space<vmem>>, vector<32x64xbf16>
    %cst_74 = arith.constant dense<0.000000e+00> : vector<256x64xf32>
    %88 = tpu.matmul %86, %87, %cst_74 {dimension_numbers = #tpu.dot_dimension_numbers<[1], [0], [0], [1], [0, 0, 1, 1], [], []>} : vector<256x32xbf16>, vector<32x64xbf16>, vector<256x64xf32> -> vector<256x64xf32>
    %c0_75 = arith.constant 0 : index
    %c0_76 = arith.constant 0 : index
    %89 = vector.load %arg7[%c0_75, %c0_76] : memref<1x64xf32, #tpu.memory_space<vmem>>, vector<1x64xf32>
    %90 = vector.broadcast %89 : vector<1x64xf32> to vector<256x64xf32>
    %91 = arith.addf %88, %90 : vector<256x64xf32>
    %92 = arith.truncf %2 : vector<256x32xf32> to vector<256x32xbf16>
    %c0_77 = arith.constant 0 : index
    %c0_78 = arith.constant 0 : index
    %93 = vector.load %arg8[%c0_77, %c0_78] : memref<32x64xbf16, #tpu.memory_space<vmem>>, vector<32x64xbf16>
    %cst_79 = arith.constant dense<0.000000e+00> : vector<256x64xf32>
    %94 = tpu.matmul %92, %93, %cst_79 {dimension_numbers = #tpu.dot_dimension_numbers<[1], [0], [0], [1], [0, 0, 1, 1], [], []>} : vector<256x32xbf16>, vector<32x64xbf16>, vector<256x64xf32> -> vector<256x64xf32>
    %c0_80 = arith.constant 0 : index
    %c0_81 = arith.constant 0 : index
    %95 = vector.load %arg9[%c0_80, %c0_81] : memref<1x64xf32, #tpu.memory_space<vmem>>, vector<1x64xf32>
    %96 = vector.broadcast %95 : vector<1x64xf32> to vector<256x64xf32>
    %97 = arith.addf %94, %96 : vector<256x64xf32>
    %cst_82 = arith.constant dense<0.000000e+00> : vector<64xf32>
    %98 = vector.multi_reduction <add>, %91, %cst_82 [0] : vector<256x64xf32> to vector<64xf32>
    %99 = vector.shape_cast %98 : vector<64xf32> to vector<1x64xf32>
    %cst_83 = arith.constant 2.560000e+02 : f32
    %100 = vector.broadcast %cst_83 : f32 to vector<1x64xf32>
    %101 = arith.divf %99, %100 : vector<1x64xf32>
    %102 = arith.truncf %101 : vector<1x64xf32> to vector<1x64xbf16>
    %c0_84 = arith.constant 0 : index
    %c0_85 = arith.constant 0 : index
    %103 = vector.load %arg10[%c0_84, %c0_85] : memref<64x4xbf16, #tpu.memory_space<vmem>>, vector<64x4xbf16>
    %cst_86 = arith.constant dense<0.000000e+00> : vector<1x4xf32>
    %104 = tpu.matmul %102, %103, %cst_86 {dimension_numbers = #tpu.dot_dimension_numbers<[1], [0], [0], [1], [0, 0, 1, 1], [], []>} : vector<1x64xbf16>, vector<64x4xbf16>, vector<1x4xf32> -> vector<1x4xf32>
    %cst_87 = arith.constant 0.000000e+00 : f32
    %105 = vector.broadcast %cst_87 : f32 to vector<1x4xf32>
    %106 = arith.maximumf %104, %105 : vector<1x4xf32>
    %107 = arith.truncf %106 : vector<1x4xf32> to vector<1x4xbf16>
    %c0_88 = arith.constant 0 : index
    %c0_89 = arith.constant 0 : index
    %108 = vector.load %arg11[%c0_88, %c0_89] : memref<4x64xbf16, #tpu.memory_space<vmem>>, vector<4x64xbf16>
    %cst_90 = arith.constant dense<0.000000e+00> : vector<1x64xf32>
    %109 = tpu.matmul %107, %108, %cst_90 {dimension_numbers = #tpu.dot_dimension_numbers<[1], [0], [0], [1], [0, 0, 1, 1], [], []>} : vector<1x4xbf16>, vector<4x64xbf16>, vector<1x64xf32> -> vector<1x64xf32>
    %110 = arith.negf %109 : vector<1x64xf32>
    %111 = math.exp %110 : vector<1x64xf32>
    %cst_91 = arith.constant 1.000000e+00 : f32
    %112 = vector.broadcast %cst_91 : f32 to vector<1x64xf32>
    %113 = arith.addf %112, %111 : vector<1x64xf32>
    %114 = arith.divf %112, %113 : vector<1x64xf32>
    %115 = vector.broadcast %114 : vector<1x64xf32> to vector<256x64xf32>
    %116 = arith.mulf %91, %115 : vector<256x64xf32>
    %117 = arith.addf %116, %97 : vector<256x64xf32>
    %cst_92 = arith.constant 0.000000e+00 : f32
    %118 = vector.broadcast %cst_92 : f32 to vector<256x64xf32>
    %119 = arith.maximumf %117, %118 : vector<256x64xf32>
    %120 = vector.shape_cast %119 : vector<256x64xf32> to vector<16x16x64xf32>
    %c0_93 = arith.constant 0 : index
    %c0_94 = arith.constant 0 : index
    %c0_95 = arith.constant 0 : index
    %c0_96 = arith.constant 0 : index
    %121 = vector.load %arg12[%c0_93, %c0_94, %c0_95, %c0_96] : memref<1x16x16x64xf32, #tpu.memory_space<vmem>>, vector<1x16x16x64xf32>
    %122 = vector.shape_cast %121 : vector<1x16x16x64xf32> to vector<16x16x64xf32>
    %123 = vector.shape_cast %120 : vector<16x16x64xf32> to vector<1x16x16x64xf32>
    tpu.vector_store %arg12[%c0_93, %c0_94, %c0_95, %c0_96], %123 {strides = array<i32>} : memref<1x16x16x64xf32, #tpu.memory_space<vmem>>, vector<1x16x16x64xf32>,
    return
  }
  func.func @transform_0(%arg0: i32) -> (i32, i32, i32, i32) {
    %c0_i32 = arith.constant 0 : i32
    %c0_i32_0 = arith.constant 0 : i32
    %c0_i32_1 = arith.constant 0 : i32
    %c0_i32_2 = arith.constant 0 : i32
    return %arg0, %c0_i32, %c0_i32_0, %c0_i32_1 : i32, i32, i32, i32
  }
  func.func @transform_1(%arg0: i32) -> (i32, i32) {
    %c0_i32 = arith.constant 0 : i32
    %c0_i32_0 = arith.constant 0 : i32
    %c0_i32_1 = arith.constant 0 : i32
    return %c0_i32, %c0_i32_0 : i32, i32
  }
  func.func @transform_2(%arg0: i32) -> (i32, i32) {
    %c0_i32 = arith.constant 0 : i32
    %c0_i32_0 = arith.constant 0 : i32
    %c0_i32_1 = arith.constant 0 : i32
    return %c0_i32, %c0_i32_0 : i32, i32
  }
  func.func @transform_3(%arg0: i32) -> (i32, i32, i32) {
    %c0_i32 = arith.constant 0 : i32
    %c0_i32_0 = arith.constant 0 : i32
    %c0_i32_1 = arith.constant 0 : i32
    %c0_i32_2 = arith.constant 0 : i32
    return %c0_i32, %c0_i32_0, %c0_i32_1 : i32, i32, i32
  }
  func.func @transform_4(%arg0: i32) -> (i32, i32) {
    %c0_i32 = arith.constant 0 : i32
    %c0_i32_0 = arith.constant 0 : i32
    %c0_i32_1 = arith.constant 0 : i32
    return %c0_i32, %c0_i32_0 : i32, i32
  }
  func.func @transform_5(%arg0: i32) -> (i32, i32) {
    %c0_i32 = arith.constant 0 : i32
    %c0_i32_0 = arith.constant 0 : i32
    %c0_i32_1 = arith.constant 0 : i32
    return %c0_i32, %c0_i32_0 : i32, i32
  }
  func.func @transform_6(%arg0: i32) -> (i32, i32) {
    %c0_i32 = arith.constant 0 : i32
    %c0_i32_0 = arith.constant 0 : i32
    %c0_i32_1 = arith.constant 0 : i32
    return %c0_i32, %c0_i32_0 : i32, i32
  }
  func.func @transform_7(%arg0: i32) -> (i32, i32) {
    %c0_i32 = arith.constant 0 : i32
    %c0_i32_0 = arith.constant 0 : i32
    %c0_i32_1 = arith.constant 0 : i32
    return %c0_i32, %c0_i32_0 : i32, i32
  }
  func.func @transform_8(%arg0: i32) -> (i32, i32) {
    %c0_i32 = arith.constant 0 : i32
    %c0_i32_0 = arith.constant 0 : i32
    %c0_i32_1 = arith.constant 0 : i32
    return %c0_i32, %c0_i32_0 : i32, i32
  }
  func.func @transform_9(%arg0: i32) -> (i32, i32) {
    %c0_i32 = arith.constant 0 : i32
    %c0_i32_0 = arith.constant 0 : i32
    %c0_i32_1 = arith.constant 0 : i32
    return %c0_i32, %c0_i32_0 : i32, i32
  }
  func.func @transform_10(%arg0: i32) -> (i32, i32) {
    %c0_i32 = arith.constant 0 : i32
    %c0_i32_0 = arith.constant 0 : i32
    %c0_i32_1 = arith.constant 0 : i32
    return %c0_i32, %c0_i32_0 : i32, i32
  }
  func.func @transform_11(%arg0: i32) -> (i32, i32, i32, i32) {
    %c0_i32 = arith.constant 0 : i32
    %c0_i32_0 = arith.constant 0 : i32
    %c0_i32_1 = arith.constant 0 : i32
    %c0_i32_2 = arith.constant 0 : i32
    return %arg0, %c0_i32, %c0_i32_0, %c0_i32_1 : i32, i32, i32, i32
  }
}

</mosaic_0001>

<bundles_post_ra>
// kernel: tpu_custom_call.1
= control target key start
LH: loop header
LB: loop body
LE: loop exit
PB: predicated region body
PF: predicated region fallthrough
CT: control target
= control target key end

     0   :  { %s4678_s0 = inlined_call_operand.hbm [shape: f32[2,16,16,32], index: 0, kind: input, shape index: {}]   ;;  %s4679_s1 = inlined_call_operand.vmem [shape: f32[1,32], index: 1, kind: input, shape index: {}]   ;;  %s4680_s2 = inlined_call_operand.hbm [shape: f32[1,32], index: 2, kind: input, shape index: {}]   ;;  %s4681_s3 = inlined_call_operand.hbm [shape: f32[9,1,32], index: 3, kind: input, shape index: {}]   ;;  %s4682_s4 = inlined_call_operand.vmem [shape: f32[1,32], index: 4, kind: input, shape index: {}]   ;;  %s4683_s5 = inlined_call_operand.vmem [shape: bf16[32,64], index: 5, kind: input, shape index: {}]   ;;  %s4684_s6 = inlined_call_operand.vmem [shape: f32[1,64], index: 6, kind: input, shape index: {}]   ;;  %s4685_s7 = inlined_call_operand.vmem [shape: bf16[32,64], index: 7, kind: input, shape index: {}]   ;;  %s4686_s8 = inlined_call_operand.vmem [shape: f32[1,64], index: 8, kind: input, shape index: {}]   ;;  %s4687_s9 = inlined_call_operand.vmem [shape: bf16[64,4], index: 9, kind: input, shape index: {}]   ;;  %s4688_s10 = inlined_call_operand.vmem [shape: bf16[4,64], index: 10, kind: input, shape index: {}]   ;;  %s4689_s11 = inlined_call_operand.hbm [shape: f32[2,16,16,64], index: 11, kind: output, shape index: {}]  }
   0x1   :  { %4715 = sst [smem:[#allocation43_spill]] %s4680_s2 }
   0x2   :  { %4716 = sst [smem:[#allocation44_spill]] %s4689_s11 }
   0x3   :  { %16 = vsyncpa [#allocation4], 0 }
   0x4   :  { %18 = vsyncpa [#allocation4 + $0x1], 0 }
   0x5   :  { %19 = vsyncpa [#allocation7], 0 }
   0x6   :  { %20 = vsyncpa [#allocation5], 0 }
   0x7   :  { %22 = vsyncpa [#allocation5 + $0x1], 0  ;;  %s3121_s17 = smov 0   ;;  %s3123_s18 = smov 0  }
   0x8   :  { %s3125_s19 = smov 0   ;;  %s3127_s20 = smov 0  }
   0x9 LB: > { %4717 = sst [smem:[#allocation13_spill]] %s3035_s17  ;;  %s3142_s21 = sadd.s32 4294967295, %s3047_s20   ;;  %s3047_s20 = sphi %s3127_s20, %s4791_s20   ;;  %s3043_s19 = sphi %s3125_s19, %s4793_s19   ;;  %s3039_s18 = sphi %s3123_s18, %s4795_s18   ;;  %s3035_s17 = sphi %s3121_s17, %s4794_s17  }
   0xa   : > { %4718 = sst [smem:[#allocation14_spill]] %s3043_s19  ;;  %s2568_s22 = sadd.s32 4294967294, %s3047_s20  }
   0xb   : > { %s3146_s23 = sadd.s32 1, %s3047_s20   ;;  %s35_s24 = sadd.s32 1, %s3043_s19 }
   0xc   : > { %4719 = sst [smem:[#allocation15_spill]] %s3146_s23  ;;  %s32_s25 = ssub.s32 %s3047_s20, %s3146_s23 }
   0xd   : > { %p42_p0 = scmp.ne.s32.totalorder %s3043_s19, %s3039_s18  ;;  %p33_p1 = scmp.eq.s32.totalorder %s32_s25, 0 }
   0xe   : > { %p43_p2 = scmp.eq.s32.totalorder %s3047_s20, 0  ;;  %p48_p3 = scmp.ne.s32.totalorder %s3039_s18, %s3035_s17 }
   0xf   : > { %p4690_p4 = scmp.eq.s32.totalorder %s3142_s21, 0  ;;  %p282_p7 = scmp.eq.s32.totalorder %s3142_s21, 1 }
  0x10   : > { %s3158_s26 = scalar_select %p33_p1, %s3043_s19, %s35_s24  }
  0x11   : > { %p3160_p5 = por %p43_p2, %p42_p0  ;;  %p3166_p6 = por %p4690_p4, %p48_p3 }
  0x12   : > { %4720 = sst [smem:[#allocation16_spill]] %s3158_s26  ;;  %p288_p8 = scmp.eq.s32.totalorder %s2568_s22, 1 }
  0x13   : > { %s4722_s28 = scalar_select %p3166_p6, 1, 0 }
  0x14   : > { %p2569_p9 = scmp.ge.s32.totalorder %s3047_s20, 1  ;;  %p295_p10 = scmp.lt.s32.totalorder %s3047_s20, 3 }
  0x15   : > { %p3173_p11 = por %p282_p7, %p42_p0  ;;  %p3177_p12 = por %p288_p8, %p48_p3 }
  0x16   : > { %p3181_p13 = pnand %p2569_p9, %p295_p10  ;;  %s3049_s13 = smov [#allocation6]  }
  0x17   : > { %s4723_s29 = scalar_select %p3173_p11, 1, 0 }
  0x18   : > { %s4725_s30 = scalar_select %p3177_p12, 1, 0 }
  0x19   : > { %4724 = sst [smem:[#allocation17_spill]] %s4723_s29  ;;  %p2790_p2 = pneg %p3181_p13 }
  0x1a   : > { %4726 = sst [smem:[#allocation18_spill]] %s4725_s30  ;;  %s311_s14 = sshll.u32 %s3049_s13, 4  ;;  %s312_s14 = int_to_ptr.vmem [resolvable:$true] %s311_s14 }
  0x1b   : > { %s4727_s12 = scalar_select %p3181_p13, 1, 0 }
  0x1c   : > { %p2807_p4 = scmp.lt.s32.totalorder %s3047_s20, 2  ;;  %p4728_p0 = scmp.eq.s32.totalorder %s3142_s21, 0 }
  0x1d   : > { %s3050_s22 = smov [#allocation8]   ;;  %s2910_s25 = scalar_lea.vmem %s312_s14, 16 }
  0x1e   : > { %p3191_p7 = pnand %p2790_p2, %p4728_p0  ;;  %p3197_p3 = pnand %p2807_p4, %p3160_p5 }
  0x1f   : > { %s321_s24 = sshll.u32 %s3050_s22, 4  ;;  %p2911_p9 = scmp.ne.s32.totalorder %s312_s14, %s2910_s25  ;;  %s3201_s24 = int_to_ptr.vmem [resolvable:$true] %s321_s24 }
  0x20   : > { %p2901_p8 = pneg %p3191_p7  ;;  %s2917_s13 = scalar_lea.vmem %s312_s14, 32 }
  0x21   : > { %p2918_p0 = scmp.lt.s32.totalorder %s312_s14, %s312_s14  ;;  %p2919_p1 = scmp.lt.s32.totalorder %s2917_s13, %s2910_s25 }
  0x22   : > { %p2913_p10 = pnand %p2911_p9, %p2901_p8 }
  0x23   : > { %p2920_p12 = por %p2919_p1, %p2918_p0 }
  0x24   : > { %p2914_p2 = pneg %p2913_p10 }
  0x26   : > { %p2921_p4 = pnand %p2920_p12, %p2914_p2 }
  0x28   : > { %2924 = shalt.err (!%p2921_p4)
}
  0x29   : > { %s4731_s2 = sld [smem:[#allocation43_spill]]  ;;  %s356_s26 = sand.u32 1, %s3043_s19  }
  0x2a   : > { %s2936_s23 = scalar_lea.vmem %s3201_s24, 144  ;;  %s2943_s25 = scalar_lea.vmem %s3201_s24, 160 }
  0x2b   : > { %p2937_p5 = scmp.ne.s32.totalorder %s3201_s24, %s2936_s23  ;;  %p2944_p9 = scmp.lt.s32.totalorder %s3201_s24, %s3201_s24 }
  0x2c   : > { %p2945_p10 = scmp.lt.s32.totalorder %s2943_s25, %s2936_s23 }
  0x2d   : > { %p2939_p1 = pnand %p2937_p5, %p2901_p8 }
  0x2e   : > { %p2946_p2 = por %p2945_p10, %p2944_p9 }
  0x2f   : > { %2793 = dma.hbm_to_vmem [thread:$0]  (!%p3191_p7), %s4731_s2, 16, %s312_s14, [#allocation7]  }
  0x30   : > { %p2940_p12 = pneg %p2939_p1 }
  0x32   : > { %p2947_p0 = pnand %p2946_p2, %p2940_p12 }
  0x34   : > { %2950 = shalt.err (!%p2947_p0)
}
  0x35   : > { %s3051_s13 = smov 16   ;;  %s3052_s14 = smov 1  }
  0x36   : > { %2796 = dma.hbm_to_vmem [thread:$0]  (!%p3191_p7), %s4681_s3, 144, %s3201_s24, [#allocation7], %s3051_s13, %s3051_s13, %s3052_s14  }
  0x37   : > { %s2573_s2 = sshll.u32 %s356_s26, 8  ;;  %s2643_s19 = sshll.u32 %s3047_s20, 12 }
  0x38   : > { %s3232_s23 = scalar_lea.hbm %s4678_s0, %s2643_s19  ;;  %s360_s25 = scalar_lea.vmem [#allocation3], %s2573_s2 }
  0x39   : > { %s367_s29 = sshll.u32 %s360_s25, 4  ;;  %s3236_s11 = scalar_lea.sflag [#allocation4], %s356_s26  ;;  %s3234_s29 = int_to_ptr.vmem [resolvable:$true] %s367_s29 }
  0x3a   : > { %s2951_s15 = scalar_lea.hbm %s3232_s23, 4096  ;;  %p2953_p7 = pneg %p3197_p3 }
  0x3b   : > { %p2952_p8 = scmp.ne.s32.totalorder %s3232_s23, %s2951_s15  ;;  %s2956_s17 = scalar_lea.hbm %s4678_s0, 8192 }
  0x3c   : > { %p2957_p1 = scmp.lt.s32.totalorder %s3232_s23, %s4678_s0  ;;  %p2958_p12 = scmp.lt.s32.totalorder %s2956_s17, %s2951_s15 }
  0x3d   : > { %p2954_p4 = pnand %p2953_p7, %p2952_p8 }
  0x3e   : > { %p2959_p9 = por %p2958_p12, %p2957_p1 }
  0x3f   : > { %p2955_p5 = pneg %p2954_p4 }
  0x41   : > { %p2960_p10 = pnand %p2959_p9, %p2955_p5 }
  0x43   : > { %2963 = shalt.err (!%p2960_p10)
}
  0x44   : > { %s2964_s2 = scalar_lea.vmem %s3234_s29, 4096  ;;  %s3053_s26 = smov [#allocation3]  }
  0x45   : > { %p2965_p2 = scmp.ne.s32.totalorder %s3234_s29, %s2964_s2  ;;  %s2969_s14 = sshll.u32 %s3053_s26, 4  ;;  %s2970_s14 = int_to_ptr.vmem [resolvable:$false] %s2969_s14 }
  0x46   : > { %s2971_s27 = scalar_lea.vmem %s2970_s14, 8192  ;;  %p2972_p4 = scmp.lt.s32.totalorder %s3234_s29, %s2970_s14 }
  0x47   : > { %p2967_p0 = pnand %p2965_p2, %p2953_p7  ;;  %p2973_p11 = scmp.lt.s32.totalorder %s2971_s27, %s2964_s2 }
  0x49   : > { %p2968_p8 = pneg %p2967_p0  ;;  %p2974_p6 = por %p2973_p11, %p2972_p4 }
  0x4b   : > { %p2975_p13 = pnand %p2974_p6, %p2968_p8 }
  0x4d   : > { %2978 = shalt.err (!%p2975_p13)
}
  0x4e   : > { %s3054_s22 = smov 128   ;;  %s3055_s25 = smov 8  }
  0x4f   : > { %2800 = dma.hbm_to_vmem [thread:$0]  (!%p3197_p3), %s3232_s23, 4096, %s3234_s29, %s3236_s11, %s3054_s22, %s3054_s22, %s3055_s25  }
  0x50   : > { %p4732_p7 = scmp.ne.s32.totalorder %s4727_s12, 0 }
  0x52   : > { %379 = sbr.rel (%p4732_p7) target bundleno = 1001 (0x3e9), region = 64 }
  0x57   : > { %s3260_s15 = sand.u32 1, %s3039_s18   ;;  %p4733_p6 = scmp.ne.s32.totalorder %s4722_s28, 0 }
  0x58   : > { %s2577_s24 = sshll.u32 %s3260_s15, 8  ;;  %s382_s13 = scalar_lea.sflag [#allocation4], %s3260_s15 }
  0x59   : > { %s3266_s17 = scalar_lea.vmem [#allocation3], %s2577_s24 }
  0x5a   : > { %3022 = dma.done.wait (%p4733_p6), %s382_s13, 4096  }
  0x5b   : > { %3024 = vsyncadd (%p4733_p6), %s382_s13, 4294963200  ;;  %p4734_p11 = scmp.eq.s32.totalorder %s3142_s21, 0 }
  0x5d   : > { %3026 = dma.done.wait (%p4734_p11), [#allocation7], 160   ;;  %p4735_p13 = pmov %p4734_p11 }
  0x5e   : > { %vm575_vm0 = vcmask 261120   ;;  %vm578_vm1 = vcmask 254976   ;;  %vm584_vm2 = vcmask 253952   ;;  %v3056_v0 = vmov 0.0   ;;  %v2853_v1 = vld [vmem:[%s4683_s5 + $0x8] sm:$0xff]   ;;  %v2854_v2 = vld [vmem:[%s4683_s5] sm:$0xff]  }
  0x5f   : > { %3028 = vsyncadd (%p4735_p13), [#allocation7], 4294967136  ;;  %576 = vst.msk [vmem:[#allocation2] sm:$0xff] %vm575_vm0, %v3056_v0  ;;  %2688 = vmatprep.subr.bf16.mxu0 %v2853_v1  ;;  %v433_v3 = vld [vmem:[%s3266_s17] sm:$0xff]  ;;  %v434_v4 = vld [vmem:[%s3266_s17 + $0x8] sm:$0xff]  ;;  %vm2125_vm3 = vcmask 523264  }
  0x60   : > { %577 = vst.msk [vmem:[#allocation2 + $0x8] sm:$0xff] %vm575_vm0, %v3056_v0  ;;  %581 = vst.msk [vmem:[#allocation2 + $0x198] sm:$0xff] %vm575_vm0, %v3056_v0  ;;  %v435_v5 = vld [vmem:[%s3266_s17 + $0x10] sm:$0xff]  ;;  %2689 = vmatpush3.bf16.msra.mxu0 %v2853_v1  ;;  %v436_v6 = vld [vmem:[%s3266_s17 + $0x18] sm:$0xff]  ;;  %vm3057_vm4 = vmmov 0   ;;  %vm2280_vm5 = vcmask 1041408  }
  0x61   : > { %579 = vst.msk [vmem:[#allocation2 + $0x10] sm:$0x3] %vm578_vm1, %v3056_v0  ;;  %583 = vst.msk [vmem:[#allocation2 + $0x1a8] sm:$0x3] %vm578_vm1, %v3056_v0  ;;  %v3371_v7 = vld [vmem:[%s4679_s1] ss:$0 sm:$0xff]  ;;  %2690 = vmatprep.subr.bf16.mxu0 %v2854_v2 }
  0x62   : > { %586 = vst.msk [vmem:[#allocation2 + $0x18] sm:$0x1] %vm584_vm2, %v3056_v0  ;;  %587 = vst.msk [vmem:[#allocation2 + $0x30] sm:$0x1] %vm584_vm2, %v3056_v0  ;;  %v3373_v8 = vld [vmem:[#allocation6] ss:$0 sm:$0xff]  ;;  %v472_v9 = vmul.f32 %v3371_v7, %v433_v3  ;;  %v473_v10 = vmul.f32 %v3371_v7, %v434_v4  ;;  %v474_v11 = vmul.f32 %v3371_v7, %v435_v5 }
  0x63   : > { %604 = vst.msk [vmem:[#allocation2 + $0x29] sm:$0x1] %vm584_vm2, %v3056_v0  ;;  %605 = vst.msk [vmem:[#allocation2 + $0x41] sm:$0x1] %vm584_vm2, %v3056_v0  ;;  %v475_v12 = vmul.f32 %v3371_v7, %v436_v6  ;;  %v3379_v15 = vld [vmem:[#allocation8] ss:$0 sm:$0xff] }
  0x64   : > { %582 = vst.msk [vmem:[#allocation2 + $0x1a0] sm:$0xff] %vm575_vm0, %v3056_v0  ;;  %v3383_v20 = vld [vmem:[#allocation8 + $0x1] ss:$0 sm:$0xff]  ;;  %v511_v21 = vadd.f32 %v3373_v8, %v472_v9  ;;  %v512_v22 = vadd.f32 %v3373_v8, %v473_v10  ;;  %v513_v23 = vadd.f32 %v3373_v8, %v474_v11  ;;  %v3389_v27 = vld [vmem:[#allocation8 + $0x2] ss:$0 sm:$0xff]  ;;  %2691 = vmatpush3.bf16.msra.mxu0 %v2854_v2  ;;  %v438_v39 = vld [vmem:[%s3266_s17 + $0x28] sm:$0xff] }
  0x65   : > { %588 = vst.msk [vmem:[#allocation2 + $0x48] sm:$0x1] %vm584_vm2, %v3056_v0  ;;  %589 = vst.msk [vmem:[#allocation2 + $0x60] sm:$0x1] %vm584_vm2, %v3056_v0  ;;  %v514_v24 = vadd.f32 %v3373_v8, %v475_v12  ;;  %2760 = vmatprep.subr.bf16.mxu0 %v3056_v0  ;;  %v437_v38 = vld [vmem:[%s3266_s17 + $0x20] sm:$0xff]  ;;  %v439_v40 = vld [vmem:[%s3266_s17 + $0x30] sm:$0xff]  ;;  %v477_v44 = vmul.f32 %v3371_v7, %v438_v39 }
  0x66   : > { %590 = vst.msk [vmem:[#allocation2 + $0x78] sm:$0x1] %vm584_vm2, %v3056_v0  ;;  %591 = vst.msk [vmem:[#allocation2 + $0x90] sm:$0x1] %vm584_vm2, %v3056_v0  ;;  %v543_v32 = vmax.f32 %v511_v21, 0.0  ;;  %v544_v33 = vmax.f32 %v512_v22, 0.0  ;;  %v476_v43 = vmul.f32 %v3371_v7, %v437_v38  ;;  %v478_v48 = vmul.f32 %v3371_v7, %v439_v40 }
  0x67   : > { %592 = vst.msk [vmem:[#allocation2 + $0xa8] sm:$0x1] %vm584_vm2, %v3056_v0  ;;  %593 = vst.msk [vmem:[#allocation2 + $0xc0] sm:$0x1] %vm584_vm2, %v3056_v0  ;;  %v655_v14 = vld [vmem:[#allocation2 + $0x8] sm:$0xff]  ;;  %v545_v34 = vmax.f32 %v513_v23, 0.0  ;;  %v516_v56 = vadd.f32 %v3373_v8, %v477_v44 }
  0x68   : > { %594 = vst.msk [vmem:[#allocation2 + $0xd8] sm:$0x1] %vm584_vm2, %v3056_v0  ;;  %595 = vst.msk [vmem:[#allocation2 + $0xf0] sm:$0x1] %vm584_vm2, %v3056_v0  ;;  %v694_v17 = vmul.f32 %v3379_v15, %v655_v14  ;;  %v725_v18 = vld [vmem:[#allocation2 + $0x1] sm:$0xff]  ;;  %v726_v19 = vld [vmem:[#allocation2 + $0x9] sm:$0xff]  ;;  %v515_v55 = vadd.f32 %v3373_v8, %v476_v43  ;;  %v517_v60 = vadd.f32 %v3373_v8, %v478_v48 }
  0x69   : > { %596 = vst.msk [vmem:[#allocation2 + $0x108] sm:$0x1] %vm584_vm2, %v3056_v0  ;;  %597 = vst.msk [vmem:[#allocation2 + $0x120] sm:$0x1] %vm584_vm2, %v3056_v0  ;;  %v829_v25 = vld [vmem:[#allocation2 + $0x2] sm:$0xff]  ;;  %v765_v28 = vmul.f32 %v3383_v20, %v725_v18  ;;  %v766_v29 = vmul.f32 %v3383_v20, %v726_v19  ;;  %v546_v35 = vmax.f32 %v514_v24, 0.0 }
  0x6a   : > { %598 = vst.msk [vmem:[#allocation2 + $0x138] sm:$0x1] %vm584_vm2, %v3056_v0  ;;  %599 = vst.msk [vmem:[#allocation2 + $0x150] sm:$0x1] %vm584_vm2, %v3056_v0  ;;  %v869_v30 = vmul.f32 %v3389_v27, %v829_v25  ;;  %v440_v45 = vld [vmem:[%s3266_s17 + $0x38] sm:$0xff]  ;;  %v441_v46 = vld [vmem:[%s3266_s17 + $0x40] sm:$0xff] }
  0x6b   : > { %600 = vst.msk [vmem:[#allocation2 + $0x168] sm:$0x1] %vm584_vm2, %v3056_v0  ;;  %601 = vst.msk [vmem:[#allocation2 + $0x180] sm:$0x1] %vm584_vm2, %v3056_v0  ;;  %v798_v37 = vadd.f32 %v766_v29, %v694_v17  ;;  %v442_v47 = vld [vmem:[%s3266_s17 + $0x48] sm:$0xff]  ;;  %v479_v49 = vmul.f32 %v3371_v7, %v440_v45  ;;  %v480_v50 = vmul.f32 %v3371_v7, %v441_v46  ;;  %v443_v52 = vld [vmem:[%s3266_s17 + $0x50] sm:$0xff] }
  0x6c   : > { %606 = vst.msk [vmem:[#allocation2 + $0x59] sm:$0x1] %vm584_vm2, %v3056_v0  ;;  %607 = vst.msk [vmem:[#allocation2 + $0x71] sm:$0x1] %vm584_vm2, %v3056_v0  ;;  %v481_v51 = vmul.f32 %v3371_v7, %v442_v47  ;;  %v444_v53 = vld [vmem:[%s3266_s17 + $0x58] sm:$0xff]  ;;  %v482_v57 = vmul.f32 %v3371_v7, %v443_v52  ;;  %v445_v1 = vld [vmem:[%s3266_s17 + $0x60] sm:$0xff] }
  0x6d   : > { %608 = vst.msk [vmem:[#allocation2 + $0x89] sm:$0x1] %vm584_vm2, %v3056_v0  ;;  %609 = vst.msk [vmem:[#allocation2 + $0xa1] sm:$0x1] %vm584_vm2, %v3056_v0  ;;  %v3418_v54 = vld [vmem:[#allocation8 + $0x3] ss:$0 sm:$0xff]  ;;  %v483_v58 = vmul.f32 %v3371_v7, %v444_v53  ;;  %v518_v61 = vadd.f32 %v3373_v8, %v479_v49  ;;  %v519_v62 = vadd.f32 %v3373_v8, %v480_v50 }
  0x6e   : > { %610 = vst.msk [vmem:[#allocation2 + $0xb9] sm:$0x1] %vm584_vm2, %v3056_v0  ;;  %611 = vst.msk [vmem:[#allocation2 + $0xd1] sm:$0x1] %vm584_vm2, %v3056_v0  ;;  %v3424_v59 = vld [vmem:[#allocation8 + $0x4] ss:$0 sm:$0xff]  ;;  %v520_v63 = vadd.f32 %v3373_v8, %v481_v51  ;;  %v521_v9 = vadd.f32 %v3373_v8, %v482_v57  ;;  %v3445_v24 = vmul.f32 %v3371_v7, %v445_v1 }
  0x6f   : > { %612 = vst.msk [vmem:[#allocation2 + $0xe9] sm:$0x1] %vm584_vm2, %v3056_v0  ;;  %613 = vst.msk [vmem:[#allocation2 + $0x101] sm:$0x1] %vm584_vm2, %v3056_v0  ;;  %v446_v2 = vld [vmem:[%s3266_s17 + $0x68] sm:$0xff]  ;;  %v547_v5 = vmax.f32 %v515_v55, 0.0  ;;  %v522_v10 = vadd.f32 %v3373_v8, %v483_v58 }
  0x70   : > { %614 = vst.msk [vmem:[#allocation2 + $0x119] sm:$0x1] %vm584_vm2, %v3056_v0  ;;  %615 = vst.msk [vmem:[#allocation2 + $0x131] sm:$0x1] %vm584_vm2, %v3056_v0  ;;  %v3432_v3 = vld [vmem:[#allocation8 + $0x5] ss:$0 sm:$0xff]  ;;  %v3448_v25 = vmul.f32 %v3371_v7, %v446_v2 }
  0x71   : > { %616 = vst.msk [vmem:[#allocation2 + $0x149] sm:$0x1] %vm584_vm2, %v3056_v0  ;;  %617 = vst.msk [vmem:[#allocation2 + $0x161] sm:$0x1] %vm584_vm2, %v3056_v0  ;;  %v3434_v4 = vld [vmem:[#allocation8 + $0x6] ss:$0 sm:$0xff] }
  0x72   : > { %618 = vst.msk [vmem:[#allocation2 + $0x179] sm:$0x1] %vm584_vm2, %v3056_v0  ;;  %619 = vst.msk [vmem:[#allocation2 + $0x191] sm:$0x1] %vm584_vm2, %v3056_v0  ;;  %v548_v6 = vmax.f32 %v516_v56, 0.0  ;;  %v550_v14 = vmax.f32 %v518_v61, 0.0 }
  0x73   : > { %585 = vst.msk [vmem:[#allocation2] sm:$0x1] %vm584_vm2, %v3056_v0  ;;  %603 = vst.msk [vmem:[#allocation2 + $0x11] sm:$0x1] %vm584_vm2, %v3056_v0  ;;  %v3438_v11 = vld [vmem:[#allocation8 + $0x7] ss:$0 sm:$0xff] }
  0x74   : > { %602 = vst.msk [vmem:[#allocation2 + $0x198] sm:$0x1] %vm584_vm2, %v3056_v0  ;;  %620 = vst.msk [vmem:[#allocation2 + $0x1a9] sm:$0x1] %vm584_vm2, %v3056_v0  ;;  %v3440_v12 = vld [vmem:[#allocation8 + $0x8] ss:$0 sm:$0xff] }
  0x75   : > { %622 = vst.msk [vmem:[#allocation2 + $0x19] sm:$0xff] %vm575_vm0, %v543_v32  ;;  %623 = vst.msk [vmem:[#allocation2 + $0x21] sm:$0xff] %vm575_vm0, %v544_v33  ;;  %v552_v17 = vmax.f32 %v520_v63, 0.0  ;;  %v553_v22 = vmax.f32 %v521_v9, 0.0  ;;  %v554_v23 = vmax.f32 %v522_v10, 0.0  ;;  %vm2276_vm6 = vcmask 31744  }
  0x76   : > { %624 = vst.msk [vmem:[#allocation2 + $0x31] sm:$0xff] %vm575_vm0, %v545_v34  ;;  %625 = vst.msk [vmem:[#allocation2 + $0x39] sm:$0xff] %vm575_vm0, %v546_v35  ;;  %s4546_s13 = scalar_lea.vmem [#allocation9], %s2577_s24  ;;  %s2644_s24 = sshll.u32 %s3142_s21, 12 }
  0x77   : > { %626 = vst.msk [vmem:[#allocation2 + $0x49] sm:$0xff] %vm575_vm0, %v547_v5  ;;  %627 = vst.msk [vmem:[#allocation2 + $0x51] sm:$0xff] %vm575_vm0, %v548_v6  ;;  %s2476_s11 = sshll.u32 %s4546_s13, 4  ;;  %s4784_s29 = sld [smem:[#allocation44_spill]]  ;;  %s4607_s11 = int_to_ptr.vmem [resolvable:$true] %s2476_s11 }
  0x78   : > { %629 = vst.msk [vmem:[#allocation2 + $0x69] sm:$0xff] %vm575_vm0, %v550_v14  ;;  %631 = vst.msk [vmem:[#allocation2 + $0x81] sm:$0xff] %vm575_vm0, %v552_v17  ;;  %s4785_s16 = sld [smem:[#allocation17_spill]]  ;;  %s2463_s23 = scalar_lea.sflag [#allocation5], %s3260_s15 }
  0x79   : > { %632 = vst.msk [vmem:[#allocation2 + $0x91] sm:$0xff] %vm575_vm0, %v553_v22  ;;  %633 = vst.msk [vmem:[#allocation2 + $0x99] sm:$0xff] %vm575_vm0, %v554_v23  ;;  %s2979_s19 = scalar_lea.vmem %s4607_s11, 4096  ;;  %s3058_s30 = smov [#allocation9]  }
  0x7a   : > { %v654_v13 = vld [vmem:[#allocation2] sm:$0xff]  ;;  %v830_v26 = vld [vmem:[#allocation2 + $0xa] sm:$0xff]  ;;  %p2980_p3 = scmp.ne.s32.totalorder %s4607_s11, %s2979_s19  ;;  %s2983_s2 = sshll.u32 %s3058_s30, 4  ;;  %s2984_s2 = int_to_ptr.vmem [resolvable:$false] %s2983_s2 }
  0x7b   : > { %v693_v16 = vmul.f32 %v3379_v15, %v654_v13  ;;  %v870_v31 = vmul.f32 %v3389_v27, %v830_v26  ;;  %v549_v13 = vmax.f32 %v517_v60, 0.0  ;;  %s2985_s26 = scalar_lea.vmem %s2984_s2, 8192  ;;  %p2986_p9 = scmp.lt.s32.totalorder %s4607_s11, %s2984_s2 }
  0x7c   : > { %v933_v18 = vld [vmem:[#allocation2 + $0x18] sm:$0xff]  ;;  %v934_v19 = vld [vmem:[#allocation2 + $0x20] sm:$0xff]  ;;  %p2987_p10 = scmp.lt.s32.totalorder %s2985_s26, %s2979_s19 }
  0x7d   : > { %v797_v36 = vadd.f32 %v765_v28, %v693_v16  ;;  %v3405_v42 = vadd.f32 %v870_v31, %v798_v37  ;;  %v551_v16 = vmax.f32 %v519_v62, 0.0  ;;  %v1037_v21 = vld [vmem:[#allocation2 + $0x19] sm:$0xff]  ;;  %v973_v26 = vmul.f32 %v3418_v54, %v933_v18  ;;  %v1038_v29 = vld [vmem:[#allocation2 + $0x21] sm:$0xff]  ;;  %628 = vst.msk [vmem:[#allocation2 + $0x61] sm:$0xff] %vm575_vm0, %v549_v13  ;;  %v1246_v37 = vld [vmem:[#allocation2 + $0x30] sm:$0xff]  ;;  %s4605_s12 = scalar_lea.hbm %s4784_s29, %s2644_s24 }
  0x7e   : > { %v974_v28 = vmul.f32 %v3418_v54, %v934_v19  ;;  %v1141_v31 = vld [vmem:[#allocation2 + $0x1a] sm:$0xff]  ;;  %v1142_v32 = vld [vmem:[#allocation2 + $0x22] sm:$0xff]  ;;  %v695_v33 = vmul.f32 %v3379_v15, %v933_v18  ;;  %v1078_v34 = vmul.f32 %v3424_v59, %v1038_v29  ;;  %v1350_v39 = vld [vmem:[#allocation2 + $0x31] sm:$0xff]  ;;  %v696_v40 = vmul.f32 %v3379_v15, %v934_v19  ;;  %p4786_p5 = scmp.ne.s32.totalorder %s4785_s16, 0  ;;  %p2988_p2 = por %p2987_p10, %p2986_p9 }
  0x7f   : > { %v3403_v41 = vadd.f32 %v869_v30, %v797_v36  ;;  %v1077_v30 = vmul.f32 %v3424_v59, %v1037_v21  ;;  %630 = vst.msk [vmem:[#allocation2 + $0x79] sm:$0xff] %vm575_vm0, %v551_v16  ;;  %v1181_v35 = vmul.f32 %v3432_v3, %v1141_v31  ;;  %v1182_v36 = vmul.f32 %v3432_v3, %v1142_v32  ;;  %v1247_v38 = vld [vmem:[#allocation2 + $0x38] sm:$0xff]  ;;  %v3482_v13 = vld [vmem:[#allocation2 + $0x48] sm:$0xff]  ;;  %v3484_v19 = vld [vmem:[#allocation2 + $0x50] sm:$0xff] }
  0x80   : > { %v1006_v44 = vadd.f32 %v974_v28, %v3405_v42  ;;  %v1286_v45 = vmul.f32 %v3434_v4, %v1246_v37  ;;  %v1287_v46 = vmul.f32 %v3434_v4, %v1247_v38  ;;  %v1351_v47 = vld [vmem:[#allocation2 + $0x39] sm:$0xff]  ;;  %v1390_v50 = vmul.f32 %v3438_v11, %v1350_v39  ;;  %v3488_v22 = vld [vmem:[#allocation2 + $0x51] sm:$0xff]  ;;  %p2981_p1 = pnand %p2980_p3, %p4786_p5 }
  0x81   : > { %v1005_v43 = vadd.f32 %v973_v26, %v3403_v41  ;;  %v1454_v48 = vld [vmem:[#allocation2 + $0x32] sm:$0xff]  ;;  %v1455_v49 = vld [vmem:[#allocation2 + $0x3a] sm:$0xff]  ;;  %v1391_v51 = vmul.f32 %v3438_v11, %v1351_v47  ;;  %v767_v41 = vmul.f32 %v3383_v20, %v1037_v21  ;;  %v768_v42 = vmul.f32 %v3383_v20, %v1038_v29  ;;  %v3486_v21 = vld [vmem:[#allocation2 + $0x49] sm:$0xff] }
  0x82   : > { %v1494_v52 = vmul.f32 %v3440_v12, %v1454_v48  ;;  %v1495_v53 = vmul.f32 %v3440_v12, %v1455_v49  ;;  %v1110_v56 = vadd.f32 %v1078_v34, %v1006_v44  ;;  %v871_v57 = vmul.f32 %v3389_v27, %v1141_v31  ;;  %v3498_v34 = vld [vmem:[#allocation2 + $0x4a] sm:$0xff]  ;;  %p2982_p12 = pneg %p2981_p1 }
  0x83   : > { %v1109_v55 = vadd.f32 %v1077_v30, %v1005_v43  ;;  %v872_v58 = vmul.f32 %v3389_v27, %v1142_v32  ;;  %v975_v60 = vmul.f32 %v3418_v54, %v1246_v37  ;;  %v976_v61 = vmul.f32 %v3418_v54, %v1247_v38 }
  0x84   : > { %v1214_v63 = vadd.f32 %v1182_v36, %v1110_v56  ;;  %v799_v1 = vadd.f32 %v767_v41, %v695_v33  ;;  %v800_v2 = vadd.f32 %v768_v42, %v696_v40  ;;  %v1079_v5 = vmul.f32 %v3424_v59, %v1350_v39  ;;  %v3505_v36 = vld [vmem:[%s4682_s4] ss:$0 sm:$0xff]  ;;  %p2989_p0 = pnand %p2988_p2, %p2982_p12 }
  0x85   : > { %v1213_v62 = vadd.f32 %v1181_v35, %v1109_v55  ;;  %v1080_v6 = vmul.f32 %v3424_v59, %v1351_v47  ;;  %v1183_v9 = vmul.f32 %v3432_v3, %v1454_v48  ;;  %v1184_v10 = vmul.f32 %v3432_v3, %v1455_v49  ;;  %v3500_v35 = vld [vmem:[#allocation2 + $0x52] sm:$0xff] }
  0x86   : > { %v1319_v16 = vadd.f32 %v1287_v46, %v1214_v63  ;;  %v903_v17 = vadd.f32 %v871_v57, %v799_v1  ;;  %v904_v18 = vadd.f32 %v872_v58, %v800_v2  ;;  %v1288_v23 = vmul.f32 %v3434_v4, %v3482_v13 }
  0x87   : > { %v1318_v14 = vadd.f32 %v1286_v45, %v1213_v62  ;;  %v1289_v26 = vmul.f32 %v3434_v4, %v3484_v19  ;;  %v1392_v28 = vmul.f32 %v3438_v11, %v3486_v21  ;;  %v1393_v29 = vmul.f32 %v3438_v11, %v3488_v22 }
  0x88   : > { %v1423_v31 = vadd.f32 %v1391_v51, %v1319_v16  ;;  %v1007_v32 = vadd.f32 %v975_v60, %v903_v17  ;;  %v1008_v33 = vadd.f32 %v976_v61, %v904_v18  ;;  %v1496_v40 = vmul.f32 %v3440_v12, %v3498_v34  ;;  %v3529_v16 = vld [vmem:[#allocation2 + $0x60] sm:$0xff] }
  0x89   : > { %v1422_v30 = vadd.f32 %v1390_v50, %v1318_v14  ;;  %v1497_v43 = vmul.f32 %v3440_v12, %v3500_v35  ;;  %v697_v44 = vmul.f32 %v3379_v15, %v1246_v37  ;;  %v698_v45 = vmul.f32 %v3379_v15, %v1247_v38 }
  0x8a   : > { %v1527_v50 = vadd.f32 %v1495_v53, %v1423_v31  ;;  %v1111_v51 = vadd.f32 %v1079_v5, %v1007_v32  ;;  %v1112_v55 = vadd.f32 %v1080_v6, %v1008_v33  ;;  %v769_v56 = vmul.f32 %v3383_v20, %v1350_v39  ;;  %v3537_v31 = vld [vmem:[#allocation2 + $0x61] sm:$0xff]  ;;  %v3542_v33 = vld [vmem:[#allocation2 + $0x69] sm:$0xff] }
  0x8b   : > { %v1526_v46 = vadd.f32 %v1494_v52, %v1422_v30  ;;  %v770_v41 = vmul.f32 %v3383_v20, %v1351_v47  ;;  %v873_v42 = vmul.f32 %v3389_v27, %v1454_v48  ;;  %v874_v57 = vmul.f32 %v3389_v27, %v1455_v49 }
  0x8c   : > { %v1566_v60 = vadd.f32 %v3505_v36, %v1527_v50  ;;  %v1215_v61 = vadd.f32 %v1183_v9, %v1111_v51  ;;  %v1216_v37 = vadd.f32 %v1184_v10, %v1112_v55  ;;  %v801_v62 = vadd.f32 %v769_v56, %v697_v44  ;;  %v1459_v55 = vld [vmem:[#allocation2 + $0x6a] sm:$0xff] }
  0x8d   : > { %v1565_v58 = vadd.f32 %v3505_v36, %v1526_v46  ;;  %v802_v38 = vadd.f32 %v770_v41, %v698_v45  ;;  %v977_v52 = vmul.f32 %v3418_v54, %v3482_v13  ;;  %v978_v39 = vmul.f32 %v3418_v54, %v3484_v19  ;;  %v3546_v45 = vld [vmem:[#allocation2 + $0x62] sm:$0xff] }
  0x8e   : > { %v1598_v47 = vmax.f32 %v1566_v60, 0.0  ;;  %v1320_v63 = vadd.f32 %v1288_v23, %v1215_v61  ;;  %v1321_v48 = vadd.f32 %v1289_v26, %v1216_v37  ;;  %v905_v1 = vadd.f32 %v873_v42, %v801_v62  ;;  %v3533_v26 = vld [vmem:[#allocation2 + $0x68] sm:$0xff] }
  0x8f   : > { %v1597_v53 = vmax.f32 %v1565_v58, 0.0  ;;  %v906_v49 = vadd.f32 %v874_v57, %v802_v38  ;;  %v1081_v2 = vmul.f32 %v3424_v59, %v3486_v21  ;;  %v1082_v5 = vmul.f32 %v3424_v59, %v3488_v22 }
  0x90   : > { %v1424_v9 = vadd.f32 %v1392_v28, %v1320_v63  ;;  %v1425_v10 = vadd.f32 %v1393_v29, %v1321_v48  ;;  %v1185_v14 = vmul.f32 %v3432_v3, %v3498_v34  ;;  %v1009_v17 = vadd.f32 %v977_v52, %v905_v1 }
  0x91   : > { %v1629_v6 = vpack.c.bf16 %v1598_v47, %v1597_v53  ;;  %v1010_v18 = vadd.f32 %v978_v39, %v906_v49  ;;  %v1186_v23 = vmul.f32 %v3432_v3, %v3500_v35  ;;  %v1290_v30 = vmul.f32 %v3434_v4, %v3529_v16 }
  0x92   : > { %v1528_v28 = vadd.f32 %v1496_v40, %v1424_v9  ;;  %v1529_v29 = vadd.f32 %v1497_v43, %v1425_v10  ;;  %v1291_v32 = vmul.f32 %v3434_v4, %v3533_v26  ;;  %v1394_v44 = vmul.f32 %v3438_v11, %v3537_v31  ;;  %v3579_v9 = vld [vmem:[#allocation2 + $0x78] sm:$0xff] }
  0x93   : > { %2692 = vmatprep.mubr.msk.bf16.mxu0 %vm575_vm0, %v1629_v6  ;;  %v1113_v46 = vadd.f32 %v1081_v2, %v1009_v17  ;;  %v1114_v50 = vadd.f32 %v1082_v5, %v1010_v18  ;;  %v1395_v51 = vmul.f32 %v3438_v11, %v3542_v33  ;;  %v1498_v40 = vmul.f32 %v3440_v12, %v3546_v45  ;;  %v3581_v18 = vld [vmem:[#allocation2 + $0x80] sm:$0xff] }
  0x94   : > { %v1567_v43 = vadd.f32 %v3505_v36, %v1528_v28  ;;  %v1568_v56 = vadd.f32 %v3505_v36, %v1529_v29  ;;  %v1499_v41 = vmul.f32 %v3440_v12, %v1459_v55  ;;  %v699_v42 = vmul.f32 %v3379_v15, %v3482_v13  ;;  %v3587_v28 = vld [vmem:[#allocation2 + $0x81] sm:$0xff] }
  0x95   : > { %v1217_v57 = vadd.f32 %v1185_v14, %v1113_v46  ;;  %v1218_v58 = vadd.f32 %v1186_v23, %v1114_v50  ;;  %v700_v60 = vmul.f32 %v3379_v15, %v3484_v19  ;;  %v771_v61 = vmul.f32 %v3383_v20, %v3486_v21  ;;  %v3595_v50 = vld [vmem:[#allocation2 + $0x7a] sm:$0xff] }
  0x96   : > { %v1599_v37 = vmax.f32 %v1567_v43, 0.0  ;;  %v1600_v62 = vmax.f32 %v1568_v56, 0.0  ;;  %v772_v38 = vmul.f32 %v3383_v20, %v3488_v22  ;;  %v875_v52 = vmul.f32 %v3389_v27, %v3498_v34  ;;  %v3599_v56 = vld [vmem:[#allocation2 + $0x82] sm:$0xff] }
  0x97   : > { %v1322_v39 = vadd.f32 %v1290_v30, %v1217_v57  ;;  %v1323_v53 = vadd.f32 %v1291_v32, %v1218_v58  ;;  %v803_v47 = vadd.f32 %v771_v61, %v699_v42  ;;  %v876_v13 = vmul.f32 %v3389_v27, %v3500_v35  ;;  %v3585_v30 = vld [vmem:[#allocation2 + $0x79] sm:$0xff] }
  0x98   : > { %v1630_v63 = vpack.c.bf16 %v1600_v62, %v1599_v37  ;;  %v804_v48 = vadd.f32 %v772_v38, %v700_v60  ;;  %v979_v19 = vmul.f32 %v3418_v54, %v3529_v16  ;;  %v980_v21 = vmul.f32 %v3418_v54, %v3533_v26 }
  0x99   : > { %v1426_v1 = vadd.f32 %v1394_v44, %v1322_v39  ;;  %v1427_v49 = vadd.f32 %v1395_v51, %v1323_v53  ;;  %v907_v22 = vadd.f32 %v875_v52, %v803_v47  ;;  %v1083_v34 = vmul.f32 %v3424_v59, %v3537_v31 }
  0x9a   : > { %2693 = vmatmul.mubr.msk.bf16.vlgmr.msra.gmra.mxu0 %vm575_vm0, %v1630_v63  ;;  %v908_v2 = vadd.f32 %v876_v13, %v804_v48  ;;  %v1084_v35 = vmul.f32 %v3424_v59, %v3542_v33  ;;  %v1187_v5 = vmul.f32 %v3432_v3, %v3546_v45  ;;  %v1188_v6 = vmul.f32 %v3432_v3, %v1459_v55 }
  0x9b   : > { %v1530_v10 = vadd.f32 %v1498_v40, %v1426_v1  ;;  %v1531_v14 = vadd.f32 %v1499_v41, %v1427_v49  ;;  %v1011_v17 = vadd.f32 %v979_v19, %v907_v22  ;;  %v1292_v23 = vmul.f32 %v3434_v4, %v3579_v9  ;;  %v1254_v49 = vld [vmem:[#allocation2 + $0x90] sm:$0xff] }
  0x9c   : > { %v1012_v29 = vadd.f32 %v980_v21, %v908_v2  ;;  %v1293_v32 = vmul.f32 %v3434_v4, %v3581_v18  ;;  %v1396_v44 = vmul.f32 %v3438_v11, %v3585_v30  ;;  %v1397_v46 = vmul.f32 %v3438_v11, %v3587_v28 }
  0x9d   : > { %v1569_v51 = vadd.f32 %v3505_v36, %v1530_v10  ;;  %v1570_v40 = vadd.f32 %v3505_v36, %v1531_v14  ;;  %v1115_v43 = vadd.f32 %v1083_v34, %v1011_v17  ;;  %v1500_v41 = vmul.f32 %v3440_v12, %v3595_v50 }
  0x9e   : > { %v1116_v42 = vadd.f32 %v1084_v35, %v1012_v29  ;;  %v1501_v57 = vmul.f32 %v3440_v12, %v3599_v56  ;;  %v701_v58 = vmul.f32 %v3379_v15, %v3529_v16  ;;  %v702_v60 = vmul.f32 %v3379_v15, %v3533_v26  ;;  %v1255_v35 = vld [vmem:[#allocation2 + $0x98] sm:$0xff] }
  0x9f   : > { %v1601_v61 = vmax.f32 %v1569_v51, 0.0  ;;  %v1602_v37 = vmax.f32 %v1570_v40, 0.0  ;;  %v1219_v62 = vadd.f32 %v1187_v5, %v1115_v43  ;;  %v773_v38 = vmul.f32 %v3383_v20, %v3537_v31  ;;  %v3641_v40 = vld [vmem:[#allocation2 + $0x9a] sm:$0xff] }
  0xa0   : > { %v1220_v52 = vadd.f32 %v1188_v6, %v1116_v42  ;;  %v774_v39 = vmul.f32 %v3383_v20, %v3542_v33  ;;  %v877_v53 = vmul.f32 %v3389_v27, %v3546_v45  ;;  %v878_v47 = vmul.f32 %v3389_v27, %v1459_v55  ;;  %v3630_v6 = vld [vmem:[#allocation2 + $0x91] sm:$0xff] }
  0xa1   : > { %v1631_v13 = vpack.c.bf16 %v1602_v37, %v1601_v61  ;;  %v1324_v16 = vadd.f32 %v1292_v23, %v1219_v62  ;;  %v805_v63 = vadd.f32 %v773_v38, %v701_v58  ;;  %v981_v26 = vmul.f32 %v3418_v54, %v3579_v9  ;;  %v3633_v23 = vld [vmem:[#allocation2 + $0x99] sm:$0xff] }
  0xa2   : > { %v1325_v48 = vadd.f32 %v1293_v32, %v1220_v52  ;;  %v806_v19 = vadd.f32 %v774_v39, %v702_v60  ;;  %v982_v31 = vmul.f32 %v3418_v54, %v3581_v18  ;;  %v1085_v21 = vmul.f32 %v3424_v59, %v3585_v30  ;;  %v3637_v32 = vld [vmem:[#allocation2 + $0x92] sm:$0xff] }
  0xa3   : > { %2696 = vmatprep.mubr.msk.bf16.mxu0 %vm575_vm0, %v1631_v13  ;;  %v1428_v33 = vadd.f32 %v1396_v44, %v1324_v16  ;;  %v909_v45 = vadd.f32 %v877_v53, %v805_v63  ;;  %v1086_v55 = vmul.f32 %v3424_v59, %v3587_v28  ;;  %v1189_v1 = vmul.f32 %v3432_v3, %v3595_v50 }
  0xa4   : > { %v1429_v22 = vadd.f32 %v1397_v46, %v1325_v48  ;;  %v910_v34 = vadd.f32 %v878_v47, %v806_v19  ;;  %v1190_v2 = vmul.f32 %v3432_v3, %v3599_v56  ;;  %v1294_v5 = vmul.f32 %v3434_v4, %v1254_v49 }
  0xa5   : > { %v1532_v10 = vadd.f32 %v1500_v41, %v1428_v33  ;;  %v1013_v14 = vadd.f32 %v981_v26, %v909_v45  ;;  %v1295_v17 = vmul.f32 %v3434_v4, %v1255_v35  ;;  %v1398_v29 = vmul.f32 %v3438_v11, %v3630_v6 }
  0xa6   : > { %v1533_v44 = vadd.f32 %v1501_v57, %v1429_v22  ;;  %v1014_v46 = vadd.f32 %v982_v31, %v910_v34  ;;  %v1399_v51 = vmul.f32 %v3438_v11, %v3633_v23  ;;  %v1502_v43 = vmul.f32 %v3440_v12, %v3637_v32  ;;  %v447_v31 = vld [vmem:[%s3266_s17 + $0x70] sm:$0xff] }
  0xa7   : > { %v1571_v41 = vadd.f32 %v3505_v36, %v1532_v10  ;;  %v1117_v42 = vadd.f32 %v1085_v21, %v1013_v14  ;;  %v1503_v58 = vmul.f32 %v3440_v12, %v3641_v40  ;;  %v523_v60 = vadd.f32 %v3373_v8, %v3445_v24 }
  0xa8   : > { %v1572_v57 = vadd.f32 %v3505_v36, %v1533_v44  ;;  %v1118_v61 = vadd.f32 %v1086_v55, %v1014_v46  ;;  %v524_v37 = vadd.f32 %v3373_v8, %v3448_v25  ;;  %v703_v62 = vmul.f32 %v3379_v15, %v3579_v9  ;;  %v448_v55 = vld [vmem:[%s3266_s17 + $0x78] sm:$0xff] }
  0xa9   : > { %v1603_v38 = vmax.f32 %v1571_v41, 0.0  ;;  %v1221_v52 = vadd.f32 %v1189_v1, %v1117_v42  ;;  %v555_v39 = vmax.f32 %v523_v60, 0.0  ;;  %v704_v53 = vmul.f32 %v3379_v15, %v3581_v18 }
  0xaa   : > { %v1604_v47 = vmax.f32 %v1572_v57, 0.0  ;;  %v1222_v13 = vadd.f32 %v1190_v2, %v1118_v61  ;;  %v556_v16 = vmax.f32 %v524_v37, 0.0  ;;  %v775_v24 = vmul.f32 %v3383_v20, %v3585_v30 }
  0xab   : > { %v1326_v63 = vadd.f32 %v1294_v5, %v1221_v52  ;;  %634 = vst.msk [vmem:[#allocation2 + $0xa9] sm:$0xff] %vm575_vm0, %v555_v39  ;;  %v776_v25 = vmul.f32 %v3383_v20, %v3587_v28  ;;  %v879_v9 = vmul.f32 %v3389_v27, %v3595_v50  ;;  %v880_v26 = vmul.f32 %v3389_v27, %v3599_v56 }
  0xac   : > { %v1632_v18 = vpack.c.bf16 %v1604_v47, %v1603_v38  ;;  %v1327_v48 = vadd.f32 %v1295_v17, %v1222_v13  ;;  %635 = vst.msk [vmem:[#allocation2 + $0xb1] sm:$0xff] %vm575_vm0, %v556_v16  ;;  %v807_v19 = vadd.f32 %v775_v24, %v703_v62  ;;  %v983_v30 = vmul.f32 %v3418_v54, %v1254_v49 }
  0xad   : > { %v1430_v21 = vadd.f32 %v1398_v29, %v1326_v63  ;;  %v808_v33 = vadd.f32 %v776_v25, %v704_v53  ;;  %v984_v45 = vmul.f32 %v3418_v54, %v1255_v35  ;;  %v1087_v28 = vmul.f32 %v3424_v59, %v3630_v6 }
  0xae   : > { %2697 = vmatmul.mubr.msk.bf16.gmra.mxu0 %vm575_vm0, %v1632_v18  ;;  %v1431_v50 = vadd.f32 %v1399_v51, %v1327_v48  ;;  %v911_v56 = vadd.f32 %v879_v9, %v807_v19  ;;  %v1088_v1 = vmul.f32 %v3424_v59, %v3633_v23  ;;  %v1191_v22 = vmul.f32 %v3432_v3, %v3637_v32 }
  0xaf   : > { %v1534_v34 = vadd.f32 %v1502_v43, %v1430_v21  ;;  %v912_v2 = vadd.f32 %v880_v26, %v808_v33  ;;  %v1192_v5 = vmul.f32 %v3432_v3, %v3641_v40  ;;  %v486_v10 = vmul.f32 %v3371_v7, %v447_v31 }
  0xb0   : > { %v1535_v14 = vadd.f32 %v1503_v58, %v1431_v50  ;;  %v1015_v17 = vadd.f32 %v983_v30, %v911_v56  ;;  %v487_v29 = vmul.f32 %v3371_v7, %v448_v55  ;;  %v705_v44 = vmul.f32 %v3379_v15, %v1254_v49  ;;  %v449_v56 = vld [vmem:[%s3266_s17 + $0x80] sm:$0xff] }
  0xb1   : > { %v1573_v46 = vadd.f32 %v3505_v36, %v1534_v34  ;;  %v1016_v51 = vadd.f32 %v984_v45, %v912_v2  ;;  %v525_v41 = vadd.f32 %v3373_v8, %v486_v10  ;;  %v706_v42 = vmul.f32 %v3379_v15, %v1255_v35 }
  0xb2   : > { %v1574_v43 = vadd.f32 %v3505_v36, %v1535_v14  ;;  %v1119_v60 = vadd.f32 %v1087_v28, %v1015_v17  ;;  %v1256_v57 = vld [vmem:[#allocation2 + $0xa8] sm:$0xff]  ;;  %v526_v37 = vadd.f32 %v3373_v8, %v487_v29  ;;  %v777_v58 = vmul.f32 %v3383_v20, %v3630_v6 }
  0xb3   : > { %v1360_v61 = vld [vmem:[#allocation2 + $0xa9] sm:$0xff]  ;;  %v1605_v62 = vmax.f32 %v1573_v46, 0.0  ;;  %v1120_v38 = vadd.f32 %v1088_v1, %v1016_v51  ;;  %v1296_v52 = vmul.f32 %v3434_v4, %v1256_v57  ;;  %v1361_v39 = vld [vmem:[#allocation2 + $0xb1] sm:$0xff]  ;;  %v557_v26 = vmax.f32 %v525_v41, 0.0 }
  0xb4   : > { %v1257_v49 = vld [vmem:[#allocation2 + $0xb0] sm:$0xff]  ;;  %v1400_v53 = vmul.f32 %v3438_v11, %v1360_v61  ;;  %v1606_v47 = vmax.f32 %v1574_v43, 0.0  ;;  %v1223_v35 = vadd.f32 %v1191_v22, %v1119_v60  ;;  %v1401_v16 = vmul.f32 %v3438_v11, %v1361_v39  ;;  %v450_v1 = vld [vmem:[%s3266_s17 + $0x88] sm:$0xff] }
  0xb5   : > { %v1297_v13 = vmul.f32 %v3434_v4, %v1257_v49  ;;  %v3694_v24 = vld [vmem:[#allocation2 + $0xaa] sm:$0xff]  ;;  %v3696_v63 = vld [vmem:[#allocation2 + $0xb2] sm:$0xff]  ;;  %v1224_v25 = vadd.f32 %v1192_v5, %v1120_v38  ;;  %v558_v19 = vmax.f32 %v526_v37, 0.0  ;;  %v778_v30 = vmul.f32 %v3383_v20, %v3633_v23  ;;  %636 = vst.msk [vmem:[#allocation2 + $0xc1] sm:$0xff] %vm575_vm0, %v557_v26 }
  0xb6   : > { %v1504_v6 = vmul.f32 %v3440_v12, %v3694_v24  ;;  %v1505_v9 = vmul.f32 %v3440_v12, %v3696_v63  ;;  %v1633_v18 = vpack.c.bf16 %v1606_v47, %v1605_v62  ;;  %v1328_v48 = vadd.f32 %v1296_v52, %v1223_v35 }
  0xb7   : > { %v1329_v31 = vadd.f32 %v1297_v13, %v1224_v25  ;;  %v809_v21 = vadd.f32 %v777_v58, %v705_v44  ;;  %v881_v33 = vmul.f32 %v3389_v27, %v3637_v32  ;;  %v882_v45 = vmul.f32 %v3389_v27, %v3641_v40  ;;  %637 = vst.msk [vmem:[#allocation2 + $0xc9] sm:$0xff] %vm575_vm0, %v558_v19 }
  0xb8   : > { %2700 = vmatprep.mubr.msk.bf16.mxu0 %vm575_vm0, %v1633_v18  ;;  %v1432_v28 = vadd.f32 %v1400_v53, %v1328_v48  ;;  %v810_v55 = vadd.f32 %v778_v30, %v706_v42  ;;  %v985_v50 = vmul.f32 %v3418_v54, %v1256_v57  ;;  %v986_v23 = vmul.f32 %v3418_v54, %v1257_v49 }
  0xb9   : > { %v1433_v22 = vadd.f32 %v1401_v16, %v1329_v31  ;;  %v913_v34 = vadd.f32 %v881_v33, %v809_v21  ;;  %v1089_v2 = vmul.f32 %v3424_v59, %v1360_v61  ;;  %v1090_v32 = vmul.f32 %v3424_v59, %v1361_v39 }
  0xba   : > { %v1536_v5 = vadd.f32 %v1504_v6, %v1432_v28  ;;  %v914_v40 = vadd.f32 %v882_v45, %v810_v55  ;;  %v1193_v10 = vmul.f32 %v3432_v3, %v3694_v24  ;;  %v1194_v14 = vmul.f32 %v3432_v3, %v3696_v63 }
  0xbb   : > { %v1537_v17 = vadd.f32 %v1505_v9, %v1433_v22  ;;  %v1017_v29 = vadd.f32 %v985_v50, %v913_v34  ;;  %v488_v44 = vmul.f32 %v3371_v7, %v449_v56  ;;  %v489_v46 = vmul.f32 %v3371_v7, %v450_v1  ;;  %v451_v34 = vld [vmem:[%s3266_s17 + $0x90] sm:$0xff] }
  0xbc   : > { %v1575_v51 = vadd.f32 %v3505_v36, %v1536_v5  ;;  %v1018_v41 = vadd.f32 %v986_v23, %v914_v40  ;;  %v707_v42 = vmul.f32 %v3379_v15, %v1256_v57  ;;  %v708_v43 = vmul.f32 %v3379_v15, %v1257_v49  ;;  %v1258_v53 = vld [vmem:[#allocation2 + $0xc0] sm:$0xff] }
  0xbd   : > { %v1576_v60 = vadd.f32 %v3505_v36, %v1537_v17  ;;  %v1121_v37 = vadd.f32 %v1089_v2, %v1017_v29  ;;  %v527_v58 = vadd.f32 %v3373_v8, %v488_v44  ;;  %v528_v62 = vadd.f32 %v3373_v8, %v489_v46  ;;  %v1362_v47 = vld [vmem:[#allocation2 + $0xc1] sm:$0xff] }
  0xbe   : > { %v1607_v38 = vmax.f32 %v1575_v51, 0.0  ;;  %v1122_v52 = vadd.f32 %v1090_v32, %v1018_v41  ;;  %v779_v35 = vmul.f32 %v3383_v20, %v1360_v61  ;;  %v780_v13 = vmul.f32 %v3383_v20, %v1361_v39  ;;  %v1259_v57 = vld [vmem:[#allocation2 + $0xc8] sm:$0xff] }
  0xbf   : > { %v1608_v16 = vmax.f32 %v1576_v60, 0.0  ;;  %v1225_v25 = vadd.f32 %v1193_v10, %v1121_v37  ;;  %v1298_v49 = vmul.f32 %v3434_v4, %v1258_v53  ;;  %v1363_v6 = vld [vmem:[#allocation2 + $0xc9] sm:$0xff]  ;;  %v1402_v9 = vmul.f32 %v3438_v11, %v1362_v47 }
  0xc0   : > { %v3733_v26 = vld [vmem:[#allocation2 + $0xc2] sm:$0xff]  ;;  %v1226_v18 = vadd.f32 %v1194_v14, %v1122_v52  ;;  %v1299_v48 = vmul.f32 %v3434_v4, %v1259_v57  ;;  %v1403_v19 = vmul.f32 %v3438_v11, %v1363_v6  ;;  %v3737_v30 = vld [vmem:[#allocation2 + $0xca] sm:$0xff]  ;;  %v559_v33 = vmax.f32 %v527_v58, 0.0 }
  0xc1   : > { %v1506_v61 = vmul.f32 %v3440_v12, %v3733_v26  ;;  %v1634_v39 = vpack.c.bf16 %v1608_v16, %v1607_v38  ;;  %v1330_v31 = vadd.f32 %v1298_v49, %v1225_v25  ;;  %v1507_v21 = vmul.f32 %v3440_v12, %v3737_v30  ;;  %v452_v2 = vld [vmem:[%s3266_s17 + $0x98] sm:$0xff] }
  0xc2   : > { %v1331_v45 = vadd.f32 %v1299_v48, %v1226_v18  ;;  %v560_v28 = vmax.f32 %v528_v62, 0.0  ;;  %v811_v55 = vadd.f32 %v779_v35, %v707_v42  ;;  %v812_v50 = vadd.f32 %v780_v13, %v708_v43  ;;  %638 = vst.msk [vmem:[#allocation2 + $0xd9] sm:$0xff] %vm575_vm0, %v559_v33 }
  0xc3   : > { %2701 = vmatmul.mubr.msk.bf16.gmra.mxu0 %vm575_vm0, %v1634_v39  ;;  %v1434_v23 = vadd.f32 %v1402_v9, %v1330_v31  ;;  %v883_v56 = vmul.f32 %v3389_v27, %v3694_v24  ;;  %v884_v1 = vmul.f32 %v3389_v27, %v3696_v63  ;;  %v987_v22 = vmul.f32 %v3418_v54, %v1258_v53 }
  0xc4   : > { %v1435_v32 = vadd.f32 %v1403_v19, %v1331_v45  ;;  %639 = vst.msk [vmem:[#allocation2 + $0xe1] sm:$0xff] %vm575_vm0, %v560_v28  ;;  %v988_v5 = vmul.f32 %v3418_v54, %v1259_v57  ;;  %v1091_v40 = vmul.f32 %v3424_v59, %v1362_v47  ;;  %v1092_v10 = vmul.f32 %v3424_v59, %v1363_v6 }
  0xc5   : > { %v1538_v14 = vadd.f32 %v1506_v61, %v1434_v23  ;;  %v915_v17 = vadd.f32 %v883_v56, %v811_v55  ;;  %v916_v29 = vadd.f32 %v884_v1, %v812_v50  ;;  %v1195_v24 = vmul.f32 %v3432_v3, %v3733_v26 }
  0xc6   : > { %v1539_v63 = vadd.f32 %v1507_v21, %v1435_v32  ;;  %v1196_v44 = vmul.f32 %v3432_v3, %v3737_v30  ;;  %v490_v46 = vmul.f32 %v3371_v7, %v451_v34  ;;  %v491_v51 = vmul.f32 %v3371_v7, %v452_v2  ;;  %v453_v34 = vld [vmem:[%s3266_s17 + $0xa0] sm:$0xff]  ;;  %v454_v2 = vld [vmem:[%s3266_s17 + $0xa8] sm:$0xff] }
  0xc7   : > { %v1577_v41 = vadd.f32 %v3505_v36, %v1538_v14  ;;  %v1019_v42 = vadd.f32 %v987_v22, %v915_v17  ;;  %v1020_v43 = vadd.f32 %v988_v5, %v916_v29  ;;  %v709_v60 = vmul.f32 %v3379_v15, %v1258_v53 }
  0xc8   : > { %v1578_v37 = vadd.f32 %v3505_v36, %v1539_v63  ;;  %v529_v58 = vadd.f32 %v3373_v8, %v490_v46  ;;  %v530_v62 = vadd.f32 %v3373_v8, %v491_v51  ;;  %v710_v38 = vmul.f32 %v3379_v15, %v1259_v57 }
  0xc9   : > { %v1609_v52 = vmax.f32 %v1577_v41, 0.0  ;;  %v1123_v35 = vadd.f32 %v1091_v40, %v1019_v42  ;;  %v1124_v13 = vadd.f32 %v1092_v10, %v1020_v43  ;;  %v781_v16 = vmul.f32 %v3383_v20, %v1362_v47  ;;  %v1260_v25 = vld [vmem:[#allocation2 + $0xd8] sm:$0xff] }
  0xca   : > { %v1610_v7 = vmax.f32 %v1578_v37, 0.0  ;;  %v3769_v49 = vld [vmem:[#allocation2 + $0xd9] sm:$0xff]  ;;  %v561_v9 = vmax.f32 %v529_v58, 0.0  ;;  %v562_v18 = vmax.f32 %v530_v62, 0.0  ;;  %v782_v53 = vmul.f32 %v3383_v20, %v1363_v6  ;;  %v3816_v37 = vld [vmem:[#allocation6] ss:$0 sm:$0xff] }
  0xcb   : > { %v1227_v48 = vadd.f32 %v1195_v24, %v1123_v35  ;;  %v1228_v19 = vadd.f32 %v1196_v44, %v1124_v13  ;;  %v1261_v61 = vld [vmem:[#allocation2 + $0xe0] sm:$0xff]  ;;  %v1300_v8 = vmul.f32 %v3434_v4, %v1260_v25  ;;  %v1404_v57 = vmul.f32 %v3438_v11, %v3769_v49 }
  0xcc   : > { %v3773_v39 = vld [vmem:[#allocation2 + $0xe1] sm:$0xff]  ;;  %v1635_v47 = vpack.c.bf16 %v1610_v7, %v1609_v52  ;;  %v1301_v21 = vmul.f32 %v3434_v4, %v1261_v61  ;;  %640 = vst.msk [vmem:[#allocation2 + $0xf1] sm:$0xff] %vm575_vm0, %v561_v9  ;;  %641 = vst.msk [vmem:[#allocation2 + $0xf9] sm:$0xff] %vm575_vm0, %v562_v18  ;;  %v813_v55 = vadd.f32 %v781_v16, %v709_v60  ;;  %v3810_v24 = vld [vmem:[%s4679_s1] ss:$0 sm:$0xff] }
  0xcd   : > { %v3777_v31 = vld [vmem:[#allocation2 + $0xda] sm:$0xff]  ;;  %v1405_v20 = vmul.f32 %v3438_v11, %v3773_v39  ;;  %v3782_v6 = vld [vmem:[#allocation2 + $0xe2] sm:$0xff]  ;;  %v1332_v45 = vadd.f32 %v1300_v8, %v1227_v48  ;;  %v814_v50 = vadd.f32 %v782_v53, %v710_v38  ;;  %v885_v56 = vmul.f32 %v3389_v27, %v3733_v26  ;;  %v3820_v38 = vld [vmem:[#allocation8] ss:$0 sm:$0xff] }
  0xce   : > { %v1508_v33 = vmul.f32 %v3440_v12, %v3777_v31  ;;  %v1509_v28 = vmul.f32 %v3440_v12, %v3782_v6  ;;  %2704 = vmatprep.mubr.msk.bf16.mxu0 %vm575_vm0, %v1635_v47  ;;  %v1333_v23 = vadd.f32 %v1301_v21, %v1228_v19  ;;  %v886_v1 = vmul.f32 %v3389_v27, %v3737_v30 }
  0xcf   : > { %v989_v22 = vmul.f32 %v3418_v54, %v1260_v25  ;;  %v1436_v32 = vadd.f32 %v1404_v57, %v1332_v45  ;;  %v990_v5 = vmul.f32 %v3418_v54, %v1261_v61  ;;  %v1093_v40 = vmul.f32 %v3424_v59, %v3769_v49 }
  0xd0   : > { %v1094_v10 = vmul.f32 %v3424_v59, %v3773_v39  ;;  %v1437_v14 = vadd.f32 %v1405_v20, %v1333_v23  ;;  %v917_v17 = vadd.f32 %v885_v56, %v813_v55  ;;  %v918_v29 = vadd.f32 %v886_v1, %v814_v50  ;;  %v3844_v1 = vld [vmem:[#allocation8 + $0x2] ss:$0 sm:$0xff] }
  0xd1   : > { %v1197_v26 = vmul.f32 %v3432_v3, %v3777_v31  ;;  %v1540_v27 = vadd.f32 %v1508_v33, %v1436_v32  ;;  %v1198_v30 = vmul.f32 %v3432_v3, %v3782_v6  ;;  %v492_v63 = vmul.f32 %v3810_v24, %v453_v34 }
  0xd2   : > { %v493_v44 = vmul.f32 %v3810_v24, %v454_v2  ;;  %v1541_v46 = vadd.f32 %v1509_v28, %v1437_v14  ;;  %v1021_v51 = vadd.f32 %v989_v22, %v917_v17  ;;  %v1022_v41 = vadd.f32 %v990_v5, %v918_v29 }
  0xd3   : > { %v711_v42 = vmul.f32 %v3379_v15, %v1260_v25  ;;  %v1579_v43 = vadd.f32 %v3505_v36, %v1540_v27  ;;  %v1262_v60 = vld [vmem:[#allocation2 + $0xf0] sm:$0xff]  ;;  %v531_v58 = vadd.f32 %v3816_v37, %v492_v63  ;;  %v712_v52 = vmul.f32 %v3820_v38, %v1261_v61  ;;  %v1263_v7 = vld [vmem:[#allocation2 + $0xf8] sm:$0xff] }
  0xd4   : > { %v532_v62 = vadd.f32 %v3816_v37, %v493_v44  ;;  %v1580_v35 = vadd.f32 %v3505_v36, %v1541_v46  ;;  %v1125_v13 = vadd.f32 %v1093_v40, %v1021_v51  ;;  %v1126_v16 = vadd.f32 %v1094_v10, %v1022_v41  ;;  %v1366_v25 = vld [vmem:[#allocation2 + $0xf1] sm:$0xff]  ;;  %v1367_v9 = vld [vmem:[#allocation2 + $0xf9] sm:$0xff]  ;;  %v3857_v10 = vld [vmem:[%s3266_s17 + $0xb8] sm:$0xff] }
  0xd5   : > { %v1302_v15 = vmul.f32 %v3434_v4, %v1262_v60  ;;  %v1611_v18 = vmax.f32 %v1579_v43, 0.0  ;;  %v1303_v53 = vmul.f32 %v3434_v4, %v1263_v7  ;;  %v1406_v48 = vmul.f32 %v3438_v11, %v1366_v25  ;;  %v3828_v8 = vld [vmem:[#allocation2 + $0xf2] sm:$0xff]  ;;  %v3830_v21 = vld [vmem:[#allocation2 + $0xfa] sm:$0xff] }
  0xd6   : > { %v1407_v19 = vmul.f32 %v3438_v11, %v1367_v9  ;;  %v1612_v57 = vmax.f32 %v1580_v35, 0.0  ;;  %v1229_v61 = vadd.f32 %v1197_v26, %v1125_v13  ;;  %v1230_v47 = vadd.f32 %v1198_v30, %v1126_v16  ;;  %v3836_v4 = vld [vmem:[#allocation8 + $0x1] ss:$0 sm:$0xff]  ;;  %v3854_v40 = vld [vmem:[%s3266_s17 + $0xb0] sm:$0xff] }
  0xd7   : > { %v1510_v20 = vmul.f32 %v3440_v12, %v3828_v8  ;;  %v1511_v33 = vmul.f32 %v3440_v12, %v3830_v21  ;;  %v563_v45 = vmax.f32 %v531_v58, 0.0  ;;  %v564_v28 = vmax.f32 %v532_v62, 0.0 }
  0xd8   : > { %v783_v11 = vmul.f32 %v3836_v4, %v3769_v49  ;;  %v1636_v55 = vpack.c.bf16 %v1612_v57, %v1611_v18  ;;  %v1334_v50 = vadd.f32 %v1302_v15, %v1229_v61  ;;  %v1335_v23 = vadd.f32 %v1303_v53, %v1230_v47  ;;  %v3881_v61 = vld [vmem:[#allocation8 + $0x7] ss:$0 sm:$0xff] }
  0xd9   : > { %v784_v56 = vmul.f32 %v3836_v4, %v3773_v39  ;;  %642 = vst.msk [vmem:[#allocation2 + $0x109] sm:$0xff] %vm575_vm0, %v563_v45  ;;  %643 = vst.msk [vmem:[#allocation2 + $0x111] sm:$0xff] %vm575_vm0, %v564_v28  ;;  %v887_v22 = vmul.f32 %v3844_v1, %v3777_v31  ;;  %v888_v49 = vmul.f32 %v3844_v1, %v3782_v6 }
  0xda   : > { %v815_v12 = vadd.f32 %v783_v11, %v711_v42  ;;  %v991_v34 = vmul.f32 %v3418_v54, %v1262_v60  ;;  %2705 = vmatmul.mubr.msk.bf16.gmra.mxu0 %vm575_vm0, %v1636_v55  ;;  %v1438_v2 = vadd.f32 %v1406_v48, %v1334_v50  ;;  %v1439_v32 = vadd.f32 %v1407_v19, %v1335_v23  ;;  %v3877_v48 = vld [vmem:[#allocation8 + $0x6] ss:$0 sm:$0xff] }
  0xdb   : > { %v816_v39 = vadd.f32 %v784_v56, %v712_v52  ;;  %v992_v5 = vmul.f32 %v3418_v54, %v1263_v7  ;;  %v1095_v17 = vmul.f32 %v3424_v59, %v1366_v25  ;;  %v1096_v31 = vmul.f32 %v3424_v59, %v1367_v9 }
  0xdc   : > { %v919_v14 = vadd.f32 %v887_v22, %v815_v12  ;;  %v1199_v6 = vmul.f32 %v3432_v3, %v3828_v8  ;;  %v1542_v29 = vadd.f32 %v1510_v20, %v1438_v2  ;;  %v1543_v26 = vadd.f32 %v1511_v33, %v1439_v32 }
  0xdd   : > { %v920_v27 = vadd.f32 %v888_v49, %v816_v39  ;;  %v1200_v30 = vmul.f32 %v3432_v3, %v3830_v21  ;;  %v494_v54 = vmul.f32 %v3810_v24, %v3854_v40  ;;  %v495_v44 = vmul.f32 %v3810_v24, %v3857_v10  ;;  %v3902_v39 = vld [vmem:[#allocation8 + $0x3] ss:$0 sm:$0xff] }
  0xde   : > { %v1023_v63 = vadd.f32 %v991_v34, %v919_v14  ;;  %v713_v46 = vmul.f32 %v3820_v38, %v1262_v60  ;;  %v1581_v59 = vadd.f32 %v3505_v36, %v1542_v29  ;;  %v1582_v51 = vadd.f32 %v3505_v36, %v1543_v26  ;;  %v3912_v29 = vld [vmem:[#allocation8 + $0x4] ss:$0 sm:$0xff] }
  0xdf   : > { %v1024_v41 = vadd.f32 %v992_v5, %v920_v27  ;;  %v714_v42 = vmul.f32 %v3820_v38, %v1263_v7  ;;  %v533_v58 = vadd.f32 %v3816_v37, %v494_v54  ;;  %v534_v3 = vadd.f32 %v3816_v37, %v495_v44 }
  0xe0   : > { %v1127_v43 = vadd.f32 %v1095_v17, %v1023_v63  ;;  %v785_v62 = vmul.f32 %v3836_v4, %v1366_v25  ;;  %v1613_v52 = vmax.f32 %v1581_v59, 0.0  ;;  %v1614_v35 = vmax.f32 %v1582_v51, 0.0  ;;  %v1264_v16 = vld [vmem:[#allocation2 + $0x108] sm:$0xff]  ;;  %v1265_v15 = vld [vmem:[#allocation2 + $0x110] sm:$0xff] }
  0xe1   : > { %v1128_v13 = vadd.f32 %v1096_v31, %v1024_v41  ;;  %v1368_v60 = vld [vmem:[#allocation2 + $0x109] sm:$0xff]  ;;  %v786_v18 = vmul.f32 %v3836_v4, %v1367_v9  ;;  %v1304_v7 = vmul.f32 %v3877_v48, %v1264_v16  ;;  %v1305_v19 = vmul.f32 %v3877_v48, %v1265_v15  ;;  %v1369_v57 = vld [vmem:[#allocation2 + $0x111] sm:$0xff]  ;;  %v3889_v9 = vld [vmem:[#allocation8 + $0x8] ss:$0 sm:$0xff] }
  0xe2   : > { %v1231_v53 = vadd.f32 %v1199_v6, %v1127_v43  ;;  %v1408_v25 = vmul.f32 %v3881_v61, %v1368_v60  ;;  %v3884_v47 = vld [vmem:[#allocation2 + $0x10a] sm:$0xff]  ;;  %v1637_v20 = vpack.c.bf16 %v1614_v35, %v1613_v52  ;;  %v1409_v45 = vmul.f32 %v3881_v61, %v1369_v57  ;;  %v3887_v28 = vld [vmem:[#allocation2 + $0x112] sm:$0xff] }
  0xe3   : > { %v1232_v33 = vadd.f32 %v1200_v30, %v1128_v13  ;;  %v1512_v11 = vmul.f32 %v3889_v9, %v3884_v47  ;;  %v1513_v50 = vmul.f32 %v3889_v9, %v3887_v28  ;;  %v565_v23 = vmax.f32 %v533_v58, 0.0  ;;  %v3907_v17 = vld [vmem:[%s3266_s17 + $0xc0] sm:$0xff]  ;;  %v3910_v31 = vld [vmem:[%s3266_s17 + $0xc8] sm:$0xff] }
  0xe4   : > { %v1336_v55 = vadd.f32 %v1304_v7, %v1231_v53  ;;  %v566_v56 = vmax.f32 %v534_v3, 0.0  ;;  %2708 = vmatprep.mubr.msk.bf16.mxu0 %vm575_vm0, %v1637_v20  ;;  %v817_v22 = vadd.f32 %v785_v62, %v713_v46  ;;  %v818_v49 = vadd.f32 %v786_v18, %v714_v42  ;;  %v3916_v63 = vld [vmem:[#allocation8 + $0x5] ss:$0 sm:$0xff] }
  0xe5   : > { %v1337_v12 = vadd.f32 %v1305_v19, %v1232_v33  ;;  %v889_v34 = vmul.f32 %v3844_v1, %v3828_v8  ;;  %644 = vst.msk [vmem:[#allocation2 + $0x121] sm:$0xff] %vm575_vm0, %v565_v23  ;;  %v890_v32 = vmul.f32 %v3844_v1, %v3830_v21  ;;  %v993_v5 = vmul.f32 %v3902_v39, %v1264_v16 }
  0xe6   : > { %v1440_v2 = vadd.f32 %v1408_v25, %v1336_v55  ;;  %645 = vst.msk [vmem:[#allocation2 + $0x129] sm:$0xff] %vm575_vm0, %v566_v56  ;;  %v994_v14 = vmul.f32 %v3902_v39, %v1265_v15  ;;  %v1097_v26 = vmul.f32 %v3912_v29, %v1368_v60  ;;  %v1098_v27 = vmul.f32 %v3912_v29, %v1369_v57 }
  0xe7   : > { %v1441_v6 = vadd.f32 %v1409_v45, %v1337_v12  ;;  %v921_v8 = vadd.f32 %v889_v34, %v817_v22  ;;  %v922_v21 = vadd.f32 %v890_v32, %v818_v49  ;;  %v1201_v54 = vmul.f32 %v3916_v63, %v3884_v47 }
  0xe8   : > { %v1544_v30 = vadd.f32 %v1512_v11, %v1440_v2  ;;  %v1202_v44 = vmul.f32 %v3916_v63, %v3887_v28  ;;  %v496_v51 = vmul.f32 %v3810_v24, %v3907_v17  ;;  %v497_v41 = vmul.f32 %v3810_v24, %v3910_v31 }
  0xe9   : > { %v1545_v46 = vadd.f32 %v1513_v50, %v1441_v6  ;;  %v1025_v59 = vadd.f32 %v993_v5, %v921_v8  ;;  %v1026_v43 = vadd.f32 %v994_v14, %v922_v21  ;;  %v715_v58 = vmul.f32 %v3820_v38, %v1264_v16  ;;  %v3965_v21 = vld [vmem:[%s3266_s17 + $0xd8] sm:$0xff] }
  0xea   : > { %v1583_v42 = vadd.f32 %v3505_v36, %v1544_v30  ;;  %v716_v3 = vmul.f32 %v3820_v38, %v1265_v15  ;;  %v535_v35 = vadd.f32 %v3816_v37, %v496_v51  ;;  %v536_v13 = vadd.f32 %v3816_v37, %v497_v41  ;;  %v3962_v30 = vld [vmem:[%s3266_s17 + $0xd0] sm:$0xff] }
  0xeb   : > { %v1584_v62 = vadd.f32 %v3505_v36, %v1545_v46  ;;  %v1129_v52 = vadd.f32 %v1097_v26, %v1025_v59  ;;  %v1130_v53 = vadd.f32 %v1098_v27, %v1026_v43  ;;  %v787_v7 = vmul.f32 %v3836_v4, %v1368_v60 }
  0xec   : > { %v1615_v18 = vmax.f32 %v1583_v42, 0.0  ;;  %v788_v19 = vmul.f32 %v3836_v4, %v1369_v57  ;;  %v1266_v33 = vld [vmem:[#allocation2 + $0x120] sm:$0xff]  ;;  %v567_v15 = vmax.f32 %v535_v35, 0.0  ;;  %v568_v11 = vmax.f32 %v536_v13, 0.0 }
  0xed   : > { %v1616_v25 = vmax.f32 %v1584_v62, 0.0  ;;  %v1233_v20 = vadd.f32 %v1201_v54, %v1129_v52  ;;  %v1267_v45 = vld [vmem:[#allocation2 + $0x128] sm:$0xff]  ;;  %v1234_v36 = vadd.f32 %v1202_v44, %v1130_v53  ;;  %v1306_v55 = vmul.f32 %v3877_v48, %v1266_v33 }
  0xee   : > { %v3934_v16 = vld [vmem:[#allocation2 + $0x121] sm:$0xff]  ;;  %v1307_v50 = vmul.f32 %v3877_v48, %v1267_v45  ;;  %v3938_v23 = vld [vmem:[#allocation2 + $0x129] sm:$0xff]  ;;  %646 = vst.msk [vmem:[#allocation2 + $0x139] sm:$0xff] %vm575_vm0, %v567_v15  ;;  %647 = vst.msk [vmem:[#allocation2 + $0x141] sm:$0xff] %vm575_vm0, %v568_v11  ;;  %v819_v5 = vadd.f32 %v787_v7, %v715_v58  ;;  %v820_v14 = vadd.f32 %v788_v19, %v716_v3 }
  0xef   : > { %v1410_v60 = vmul.f32 %v3881_v61, %v3934_v16  ;;  %v3942_v56 = vld [vmem:[#allocation2 + $0x122] sm:$0xff]  ;;  %v3944_v57 = vld [vmem:[#allocation2 + $0x12a] sm:$0xff]  ;;  %v1638_v12 = vpack.c.bf16 %v1616_v25, %v1615_v18  ;;  %v1411_v22 = vmul.f32 %v3881_v61, %v3938_v23  ;;  %v1338_v2 = vadd.f32 %v1306_v55, %v1233_v20  ;;  %v3984_v18 = vld [vmem:[%s4682_s4] ss:$0 sm:$0xff] }
  0xf0   : > { %v1514_v49 = vmul.f32 %v3889_v9, %v3942_v56  ;;  %v1515_v34 = vmul.f32 %v3889_v9, %v3944_v57  ;;  %v1339_v32 = vadd.f32 %v1307_v50, %v1234_v36  ;;  %v891_v6 = vmul.f32 %v3844_v1, %v3884_v47 }
  0xf1   : > { %2709 = vmatmul.mubr.msk.bf16.gmra.mxu0 %vm575_vm0, %v1638_v12  ;;  %v892_v8 = vmul.f32 %v3844_v1, %v3887_v28  ;;  %v995_v26 = vmul.f32 %v3902_v39, %v1266_v33  ;;  %v996_v27 = vmul.f32 %v3902_v39, %v1267_v45  ;;  %v1442_v54 = vadd.f32 %v1410_v60, %v1338_v2 }
  0xf2   : > { %v1443_v44 = vadd.f32 %v1411_v22, %v1339_v32  ;;  %v1099_v46 = vmul.f32 %v3912_v29, %v3934_v16  ;;  %v1100_v59 = vmul.f32 %v3912_v29, %v3938_v23  ;;  %v923_v47 = vadd.f32 %v891_v6, %v819_v5 }
  0xf3   : > { %v924_v51 = vadd.f32 %v892_v8, %v820_v14  ;;  %v1203_v28 = vmul.f32 %v3916_v63, %v3942_v56  ;;  %v1204_v41 = vmul.f32 %v3916_v63, %v3944_v57  ;;  %v1546_v42 = vadd.f32 %v1514_v49, %v1442_v54 }
  0xf4   : > { %v1547_v43 = vadd.f32 %v1515_v34, %v1443_v44  ;;  %v498_v58 = vmul.f32 %v3810_v24, %v3962_v30  ;;  %v499_v3 = vmul.f32 %v3810_v24, %v3965_v21  ;;  %v1027_v62 = vadd.f32 %v995_v26, %v923_v47 }
  0xf5   : > { %v1028_v52 = vadd.f32 %v996_v27, %v924_v51  ;;  %v717_v35 = vmul.f32 %v3820_v38, %v1266_v33  ;;  %v718_v13 = vmul.f32 %v3820_v38, %v1267_v45  ;;  %v1585_v53 = vadd.f32 %v3984_v18, %v1546_v42  ;;  %v1268_v19 = vld [vmem:[#allocation2 + $0x138] sm:$0xff]  ;;  %v1269_v25 = vld [vmem:[#allocation2 + $0x140] sm:$0xff]  ;;  %v4016_v42 = vld [vmem:[%s3266_s17 + $0xe0] sm:$0xff] }
  0xf6   : > { %v1586_v7 = vadd.f32 %v3984_v18, %v1547_v43  ;;  %v537_v20 = vadd.f32 %v3816_v37, %v498_v58  ;;  %v538_v15 = vadd.f32 %v3816_v37, %v499_v3  ;;  %v1131_v11 = vadd.f32 %v1099_v46, %v1027_v62  ;;  %v1372_v55 = vld [vmem:[#allocation2 + $0x139] sm:$0xff]  ;;  %v1373_v50 = vld [vmem:[#allocation2 + $0x141] sm:$0xff] }
  0xf7   : > { %v1132_v36 = vadd.f32 %v1100_v59, %v1028_v52  ;;  %v1308_v33 = vmul.f32 %v3877_v48, %v1268_v19  ;;  %v1309_v45 = vmul.f32 %v3877_v48, %v1269_v25  ;;  %v1617_v60 = vmax.f32 %v1585_v53, 0.0  ;;  %v3994_v34 = vld [vmem:[#allocation2 + $0x13a] sm:$0xff]  ;;  %v3996_v2 = vld [vmem:[#allocation2 + $0x142] sm:$0xff] }
  0xf8   : > { %v1618_v12 = vmax.f32 %v1586_v7, 0.0  ;;  %v1412_v22 = vmul.f32 %v3881_v61, %v1372_v55  ;;  %v1413_v49 = vmul.f32 %v3881_v61, %v1373_v50  ;;  %v1235_v32 = vadd.f32 %v1203_v28, %v1131_v11  ;;  %v4020_v3 = vld [vmem:[%s3266_s17 + $0xe8] sm:$0xff] }
  0xf9   : > { %v1236_v5 = vadd.f32 %v1204_v41, %v1132_v36  ;;  %v1516_v14 = vmul.f32 %v3889_v9, %v3994_v34  ;;  %v1517_v6 = vmul.f32 %v3889_v9, %v3996_v2  ;;  %v569_v26 = vmax.f32 %v537_v20, 0.0 }
  0xfa   : > { %v1639_v8 = vpack.c.bf16 %v1618_v12, %v1617_v60  ;;  %v570_v27 = vmax.f32 %v538_v15, 0.0  ;;  %v789_v54 = vmul.f32 %v3836_v4, %v3934_v16  ;;  %v1340_v44 = vadd.f32 %v1308_v33, %v1235_v32 }
  0xfb   : > { %v1341_v46 = vadd.f32 %v1309_v45, %v1236_v5  ;;  %v790_v59 = vmul.f32 %v3836_v4, %v3938_v23  ;;  %v893_v47 = vmul.f32 %v3844_v1, %v3942_v56  ;;  %648 = vst.msk [vmem:[#allocation2 + $0x151] sm:$0xff] %vm575_vm0, %v569_v26  ;;  %v894_v28 = vmul.f32 %v3844_v1, %v3944_v57 }
  0xfc   : > { %2712 = vmatprep.mubr.msk.bf16.mxu0 %vm575_vm0, %v1639_v8  ;;  %649 = vst.msk [vmem:[#allocation2 + $0x159] sm:$0xff] %vm575_vm0, %v570_v27  ;;  %v821_v51 = vadd.f32 %v789_v54, %v717_v35  ;;  %v997_v16 = vmul.f32 %v3902_v39, %v1268_v19  ;;  %v998_v41 = vmul.f32 %v3902_v39, %v1269_v25 }
  0xfd   : > { %v1444_v23 = vadd.f32 %v1412_v22, %v1340_v44  ;;  %v1445_v43 = vadd.f32 %v1413_v49, %v1341_v46  ;;  %v822_v58 = vadd.f32 %v790_v59, %v718_v13  ;;  %v1101_v56 = vmul.f32 %v3912_v29, %v1372_v55 }
  0xfe   : > { %v925_v62 = vadd.f32 %v893_v47, %v821_v51  ;;  %v1102_v52 = vmul.f32 %v3912_v29, %v1373_v50  ;;  %v1205_v35 = vmul.f32 %v3916_v63, %v3994_v34  ;;  %v1206_v57 = vmul.f32 %v3916_v63, %v3996_v2 }
  0xff   : > { %v1548_v53 = vadd.f32 %v1516_v14, %v1444_v23  ;;  %v1549_v7 = vadd.f32 %v1517_v6, %v1445_v43  ;;  %v926_v20 = vadd.f32 %v894_v28, %v822_v58  ;;  %v500_v15 = vmul.f32 %v3810_v24, %v4016_v42 }
 0x100   : > { %v1029_v13 = vadd.f32 %v997_v16, %v925_v62  ;;  %v501_v11 = vmul.f32 %v3810_v24, %v4020_v3  ;;  %v719_v36 = vmul.f32 %v3820_v38, %v1268_v19  ;;  %v720_v33 = vmul.f32 %v3820_v38, %v1269_v25 }
 0x101   : > { %v1587_v45 = vadd.f32 %v3984_v18, %v1548_v53  ;;  %v1588_v60 = vadd.f32 %v3984_v18, %v1549_v7  ;;  %v1030_v12 = vadd.f32 %v998_v41, %v926_v20  ;;  %v539_v22 = vadd.f32 %v3816_v37, %v500_v15  ;;  %v4061_v7 = vld [vmem:[%s3266_s17 + $0xf0] sm:$0xff] }
 0x102   : > { %v1133_v49 = vadd.f32 %v1101_v56, %v1029_v13  ;;  %v540_v32 = vadd.f32 %v3816_v37, %v501_v11  ;;  %v791_v5 = vmul.f32 %v3836_v4, %v1372_v55  ;;  %v792_v14 = vmul.f32 %v3836_v4, %v1373_v50  ;;  %v1270_v19 = vld [vmem:[#allocation2 + $0x150] sm:$0xff] }
 0x103   : > { %v1619_v6 = vmax.f32 %v1587_v45, 0.0  ;;  %v1620_v8 = vmax.f32 %v1588_v60, 0.0  ;;  %v1134_v26 = vadd.f32 %v1102_v52, %v1030_v12  ;;  %v1271_v27 = vld [vmem:[#allocation2 + $0x158] sm:$0xff]  ;;  %v571_v54 = vmax.f32 %v539_v22, 0.0 }
 0x104   : > { %v1374_v25 = vld [vmem:[#allocation2 + $0x151] sm:$0xff]  ;;  %v1237_v44 = vadd.f32 %v1205_v35, %v1133_v49  ;;  %v1310_v46 = vmul.f32 %v3877_v48, %v1270_v19  ;;  %v1311_v59 = vmul.f32 %v3877_v48, %v1271_v27  ;;  %v4041_v47 = vld [vmem:[#allocation2 + $0x159] sm:$0xff]  ;;  %v572_v56 = vmax.f32 %v540_v32, 0.0 }
 0x105   : > { %v1414_v51 = vmul.f32 %v3881_v61, %v1374_v25  ;;  %v4044_v28 = vld [vmem:[#allocation2 + $0x152] sm:$0xff]  ;;  %v1640_v55 = vpack.c.bf16 %v1620_v8, %v1619_v6  ;;  %v1238_v50 = vadd.f32 %v1206_v57, %v1134_v26  ;;  %v1415_v16 = vmul.f32 %v3881_v61, %v4041_v47  ;;  %v4048_v41 = vld [vmem:[#allocation2 + $0x15a] sm:$0xff]  ;;  %650 = vst.msk [vmem:[#allocation2 + $0x169] sm:$0xff] %vm575_vm0, %v571_v54 }
 0x106   : > { %v1518_v23 = vmul.f32 %v3889_v9, %v4044_v28  ;;  %v1342_v43 = vadd.f32 %v1310_v46, %v1237_v44  ;;  %v1519_v58 = vmul.f32 %v3889_v9, %v4048_v41  ;;  %v823_v62 = vadd.f32 %v791_v5, %v719_v36  ;;  %651 = vst.msk [vmem:[#allocation2 + $0x171] sm:$0xff] %vm575_vm0, %v572_v56  ;;  %v4068_v36 = vld [vmem:[%s3266_s17 + $0xf8] sm:$0xff] }
 0x107   : > { %2713 = vmatmul.mubr.msk.bf16.gmra.mxu0 %vm575_vm0, %v1640_v55  ;;  %v1343_v52 = vadd.f32 %v1311_v59, %v1238_v50  ;;  %v824_v35 = vadd.f32 %v792_v14, %v720_v33  ;;  %v895_v57 = vmul.f32 %v3844_v1, %v3994_v34  ;;  %v896_v53 = vmul.f32 %v3844_v1, %v3996_v2 }
 0x108   : > { %v1446_v20 = vadd.f32 %v1414_v51, %v1342_v43  ;;  %v999_v15 = vmul.f32 %v3902_v39, %v1270_v19  ;;  %v1000_v13 = vmul.f32 %v3902_v39, %v1271_v27  ;;  %v1103_v11 = vmul.f32 %v3912_v29, %v1374_v25 }
 0x109   : > { %v1447_v33 = vadd.f32 %v1415_v16, %v1343_v52  ;;  %v927_v45 = vadd.f32 %v895_v57, %v823_v62  ;;  %v928_v60 = vadd.f32 %v896_v53, %v824_v35  ;;  %v1104_v34 = vmul.f32 %v3912_v29, %v4041_v47 }
 0x10a   : > { %v1550_v2 = vadd.f32 %v1518_v23, %v1446_v20  ;;  %v1207_v12 = vmul.f32 %v3916_v63, %v4044_v28  ;;  %v1208_v22 = vmul.f32 %v3916_v63, %v4048_v41  ;;  %v502_v49 = vmul.f32 %v3810_v24, %v4061_v7 }
 0x10b   : > { %v1551_v32 = vadd.f32 %v1519_v58, %v1447_v33  ;;  %v1031_v5 = vadd.f32 %v999_v15, %v927_v45  ;;  %v1032_v14 = vadd.f32 %v1000_v13, %v928_v60  ;;  %v503_v6 = vmul.f32 %v3810_v24, %v4068_v36 }
 0x10c   : > { %v1589_v8 = vadd.f32 %v3984_v18, %v1550_v2  ;;  %v1272_v26 = vld [vmem:[#allocation2 + $0x168] sm:$0xff]  ;;  %v541_v54 = vadd.f32 %v3816_v37, %v502_v49  ;;  %v721_v44 = vmul.f32 %v3820_v38, %v1270_v19  ;;  %v722_v46 = vmul.f32 %v3820_v38, %v1271_v27 }
 0x10d   : > { %v1590_v59 = vadd.f32 %v3984_v18, %v1551_v32  ;;  %v1135_v51 = vadd.f32 %v1103_v11, %v1031_v5  ;;  %v1136_v55 = vadd.f32 %v1104_v34, %v1032_v14  ;;  %v1312_v50 = vmul.f32 %v3877_v48, %v1272_v26  ;;  %v1376_v16 = vld [vmem:[#allocation2 + $0x169] sm:$0xff]  ;;  %v1377_v19 = vld [vmem:[#allocation2 + $0x171] sm:$0xff] }
 0x10e   : > { %v1621_v23 = vmax.f32 %v1589_v8, 0.0  ;;  %v1416_v43 = vmul.f32 %v3881_v61, %v1376_v16  ;;  %v542_v24 = vadd.f32 %v3816_v37, %v503_v6  ;;  %v573_v58 = vmax.f32 %v541_v54, 0.0  ;;  %v1273_v35 = vld [vmem:[#allocation2 + $0x170] sm:$0xff] }
 0x10f   : > { %v1622_v56 = vmax.f32 %v1590_v59, 0.0  ;;  %v1239_v62 = vadd.f32 %v1207_v12, %v1135_v51  ;;  %v1240_v52 = vadd.f32 %v1208_v22, %v1136_v55  ;;  %v1480_v57 = vld [vmem:[#allocation2 + $0x16a] sm:$0xff]  ;;  %v793_v27 = vmul.f32 %v3836_v4, %v1374_v25  ;;  %v1481_v15 = vld [vmem:[#allocation2 + $0x172] sm:$0xff] }
 0x110   : > { %v1313_v53 = vmul.f32 %v3877_v48, %v1273_v35  ;;  %v1417_v20 = vmul.f32 %v3881_v61, %v1377_v19  ;;  %v1520_v13 = vmul.f32 %v3889_v9, %v1480_v57  ;;  %v574_v11 = vmax.f32 %v542_v24, 0.0  ;;  %652 = vst.msk [vmem:[#allocation2 + $0x181] sm:$0xff] %vm575_vm0, %v573_v58 }
 0x111   : > { %v1641_v37 = vpack.c.bf16 %v1622_v56, %v1621_v23  ;;  %v1344_v33 = vadd.f32 %v1312_v50, %v1239_v62  ;;  %v1521_v45 = vmul.f32 %v3889_v9, %v1481_v15  ;;  %v794_v60 = vmul.f32 %v3836_v4, %v4041_v47 }
 0x112   : > { %v1345_v34 = vadd.f32 %v1313_v53, %v1240_v52  ;;  %653 = vst.msk [vmem:[#allocation2 + $0x189] sm:$0xff] %vm575_vm0, %v574_v11  ;;  %v825_v25 = vadd.f32 %v793_v27, %v721_v44  ;;  %v897_v2 = vmul.f32 %v3844_v1, %v4044_v28  ;;  %v898_v12 = vmul.f32 %v3844_v1, %v4048_v41 }
 0x113   : > { %2716 = vmatprep.mubr.msk.bf16.mxu0 %vm575_vm0, %v1641_v37  ;;  %v1448_v22 = vadd.f32 %v1416_v43, %v1344_v33  ;;  %v826_v49 = vadd.f32 %v794_v60, %v722_v46  ;;  %v1001_v32 = vmul.f32 %v3902_v39, %v1272_v26  ;;  %v1002_v5 = vmul.f32 %v3902_v39, %v1273_v35 }
 0x114   : > { %v1449_v14 = vadd.f32 %v1417_v20, %v1345_v34  ;;  %v929_v47 = vadd.f32 %v897_v2, %v825_v25  ;;  %v1105_v6 = vmul.f32 %v3912_v29, %v1376_v16  ;;  %v1106_v8 = vmul.f32 %v3912_v29, %v1377_v19 }
 0x115   : > { %v1552_v54 = vadd.f32 %v1520_v13, %v1448_v22  ;;  %v930_v44 = vadd.f32 %v898_v12, %v826_v49  ;;  %v1209_v28 = vmul.f32 %v3916_v63, %v1480_v57  ;;  %v1210_v41 = vmul.f32 %v3916_v63, %v1481_v15 }
 0x116   : > { %v1553_v59 = vadd.f32 %v1521_v45, %v1449_v14  ;;  %v1033_v51 = vadd.f32 %v1001_v32, %v929_v47  ;;  %v723_v46 = vmul.f32 %v3820_v38, %v1272_v26  ;;  %v724_v55 = vmul.f32 %v3820_v38, %v1273_v35 }
 0x117   : > { %v1591_v50 = vadd.f32 %v3984_v18, %v1552_v54  ;;  %v1034_v23 = vadd.f32 %v1002_v5, %v930_v44  ;;  %v1274_v43 = vld [vmem:[#allocation2 + $0x180] sm:$0xff]  ;;  %v795_v58 = vmul.f32 %v3836_v4, %v1376_v16  ;;  %v796_v56 = vmul.f32 %v3836_v4, %v1377_v19 }
 0x118   : > { %v1378_v24 = vld [vmem:[#allocation2 + $0x181] sm:$0xff]  ;;  %v1592_v62 = vadd.f32 %v3984_v18, %v1553_v59  ;;  %v1137_v52 = vadd.f32 %v1105_v6, %v1033_v51  ;;  %v1314_v27 = vmul.f32 %v3877_v48, %v1274_v43  ;;  %v899_v2 = vmul.f32 %v3844_v1, %v1480_v57  ;;  %v2855_v57 = vld [vmem:[%s4687_s9 + $0x18] sm:$0xff]  }
 0x119   : > { %v1418_v53 = vmul.f32 %v3881_v61, %v1378_v24  ;;  %v1623_v20 = vmax.f32 %v1591_v50, 0.0  ;;  %v1138_v26 = vadd.f32 %v1106_v8, %v1034_v23  ;;  %v1275_v13 = vld [vmem:[#allocation2 + $0x188] sm:$0xff]  ;;  %v827_v35 = vadd.f32 %v795_v58, %v723_v46  ;;  %v1277_v59 = vld [vmem:[#allocation2 + $0x1a0] sm:$0xff]  ;;  %2761 = vmatpush3.bf16.msra.mxu0 %v2855_v57 }
 0x11a   : > { %v1379_v38 = vld [vmem:[#allocation2 + $0x189] sm:$0xff]  ;;  %v828_v11 = vadd.f32 %v796_v56, %v724_v55  ;;  %v1624_v37 = vmax.f32 %v1592_v62, 0.0  ;;  %v1241_v33 = vadd.f32 %v1209_v28, %v1137_v52  ;;  %v1315_v45 = vmul.f32 %v3877_v48, %v1275_v13  ;;  %v1276_v28 = vld [vmem:[#allocation2 + $0x198] sm:$0xff]  ;;  %2762 = vmatprep.subr.bf16.mxu0 %v3056_v0 }
 0x11b   : > { %v1419_v16 = vmul.f32 %v3881_v61, %v1379_v38  ;;  %v1482_v4 = vld [vmem:[#allocation2 + $0x182] sm:$0xff]  ;;  %v1483_v19 = vld [vmem:[#allocation2 + $0x18a] sm:$0xff]  ;;  %v1242_v60 = vadd.f32 %v1210_v41, %v1138_v26  ;;  %v900_v49 = vmul.f32 %v3844_v1, %v1481_v15  ;;  %v1003_v32 = vmul.f32 %v3902_v39, %v1274_v43  ;;  %v1380_v55 = vld [vmem:[#allocation2 + $0x199] sm:$0xff] }
 0x11c   : > { %v1522_v34 = vmul.f32 %v3889_v9, %v1482_v4  ;;  %v1523_v25 = vmul.f32 %v3889_v9, %v1483_v19  ;;  %v1642_v12 = vpack.c.bf16 %v1624_v37, %v1623_v20  ;;  %v1346_v22 = vadd.f32 %v1314_v27, %v1241_v33  ;;  %v1381_v43 = vld [vmem:[#allocation2 + $0x1a1] sm:$0xff] }
 0x11d   : > { %v1347_v5 = vadd.f32 %v1315_v45, %v1242_v60  ;;  %v931_v14 = vadd.f32 %v899_v2, %v827_v35  ;;  %v1004_v47 = vmul.f32 %v3902_v39, %v1275_v13  ;;  %v1107_v6 = vmul.f32 %v3912_v29, %v1378_v24  ;;  %v1484_v62 = vld [vmem:[#allocation2 + $0x19a] sm:$0xff] }
 0x11e   : > { %2717 = vmatmul.mubr.msk.bf16.gmra.mxu0 %vm575_vm0, %v1642_v12  ;;  %v1450_v8 = vadd.f32 %v1418_v53, %v1346_v22  ;;  %v932_v54 = vadd.f32 %v900_v49, %v828_v11  ;;  %v1108_v44 = vmul.f32 %v3912_v29, %v1379_v38  ;;  %v1211_v41 = vmul.f32 %v3916_v63, %v1482_v4  ;;  %v1485_v53 = vld [vmem:[#allocation2 + $0x1a2] sm:$0xff] }
 0x11f   : > { %v1451_v1 = vadd.f32 %v1419_v16, %v1347_v5  ;;  %v1035_v15 = vadd.f32 %v1003_v32, %v931_v14  ;;  %v1212_v46 = vmul.f32 %v3916_v63, %v1483_v19  ;;  %v1316_v29 = vmul.f32 %v3877_v48, %v1276_v28  ;;  %v2857_v12 = vld [vmem:[%s4687_s9 + $0x8] sm:$0xff]   ;;  %v4156_v5 = vld [vmem:[%s4684_s6] ss:$0 sm:$0xff] }
 0x120   : > { %v1554_v51 = vadd.f32 %v1522_v34, %v1450_v8  ;;  %v1036_v39 = vadd.f32 %v1004_v47, %v932_v54  ;;  %v1317_v56 = vmul.f32 %v3877_v48, %v1277_v59  ;;  %v1420_v63 = vmul.f32 %v3881_v61, %v1380_v55  ;;  %v2860_v55 = vld [vmem:[%s4685_s7] sm:$0xff]  }
 0x121   : > { %v1555_v50 = vadd.f32 %v1523_v25, %v1451_v1  ;;  %v1139_v23 = vadd.f32 %v1107_v6, %v1035_v15  ;;  %v1421_v13 = vmul.f32 %v3881_v61, %v1381_v43  ;;  %v1524_v11 = vmul.f32 %v3889_v9, %v1484_v62  ;;  %v2858_v1 = vld [vmem:[%s4687_s9] sm:$0xff]  }
 0x122   : > { %v1593_v24 = vadd.f32 %v3984_v18, %v1554_v51  ;;  %v1140_v58 = vadd.f32 %v1108_v44, %v1036_v39  ;;  %v1525_v33 = vmul.f32 %v3889_v9, %v1485_v53  ;;  %v2856_v9 = vld [vmem:[%s4687_s9 + $0x10] sm:$0xff]   ;;  %v2879_v53 = vld [vmem:[%s3266_s17 + $0x10] sm:$0xff] }
 0x123   : > { %v1594_v52 = vadd.f32 %v3984_v18, %v1555_v50  ;;  %v1243_v27 = vadd.f32 %v1211_v41, %v1139_v23  ;;  %2763 = vmatpush3.bf16.msra.mxu0 %v2856_v9  ;;  %v2877_v50 = vld [vmem:[%s3266_s17] sm:$0xff]  ;;  %v2878_v23 = vld [vmem:[%s3266_s17 + $0x8] sm:$0xff] }
 0x124   : > { %v1625_v20 = vmax.f32 %v1593_v24, 0.0  ;;  %v1244_v26 = vadd.f32 %v1212_v46, %v1140_v58  ;;  %2764 = vmatprep.subr.bf16.mxu0 %v3056_v0  ;;  %v2859_v46 = vld [vmem:[%s4685_s7 + $0x8] sm:$0xff]   ;;  %v2886_v9 = vld [vmem:[%s3266_s17 + $0x48] sm:$0xff] }
 0x125   : > { %v1626_v38 = vmax.f32 %v1594_v52, 0.0  ;;  %v1348_v35 = vadd.f32 %v1316_v29, %v1243_v27  ;;  %v1877_v29 = vpack.c.bf16 %v2878_v23, %v2877_v50  ;;  %2724 = vmatprep.subr.bf16.mxu1 %v2859_v46  ;;  %v2275_v27 = vld [vmem:[%s4688_s10] sm:$0x3] }
 0x126   : > { %v1349_v37 = vadd.f32 %v1317_v56, %v1244_v26  ;;  %2725 = vmatpush3.bf16.msra.mxu1 %v2859_v46 }
 0x127   : > { %v1643_v45 = vpack.c.bf16 %v1626_v38, %v1625_v20  ;;  %v1452_v48 = vadd.f32 %v1420_v63, %v1348_v35  ;;  %2765 = vmatpush3.bf16.msra.mxu0 %v2857_v12  ;;  %2728 = vmatprep.mubr.msk.bf16.mxu1 %vm575_vm0, %v1877_v29  ;;  %v2880_v20 = vld [vmem:[%s3266_s17 + $0x18] sm:$0xff]  ;;  %v2881_v38 = vld [vmem:[%s3266_s17 + $0x20] sm:$0xff]  ;;  %v2882_v35 = vld [vmem:[%s3266_s17 + $0x28] sm:$0xff] }
 0x128   : > { %v1453_v16 = vadd.f32 %v1421_v13, %v1349_v37  ;;  %2766 = vmatprep.subr.bf16.mxu0 %v3056_v0  ;;  %2726 = vmatprep.subr.bf16.mxu1 %v2860_v55  ;;  %v1878_v26 = vpack.c.bf16 %v2880_v20, %v2879_v53  ;;  %v2894_v20 = vld [vmem:[%s3266_s17 + $0x88] sm:$0xff] }
 0x129   : > { %2720 = vmatprep.mubr.msk.bf16.mxu0 %vm575_vm0, %v1643_v45  ;;  %v1556_v4 = vadd.f32 %v1524_v11, %v1452_v48  ;;  %v1879_v11 = vpack.c.bf16 %v2882_v35, %v2881_v38 }
 0x12a   : > { %v1557_v19 = vadd.f32 %v1525_v33, %v1453_v16  ;;  %2727 = vmatpush3.bf16.msra.mxu1 %v2860_v55  ;;  %v2282_v33 = vsel %vm2280_vm5, %v2275_v27, 0  ;;  %v2891_v27 = vld [vmem:[%s3266_s17 + $0x70] sm:$0xff] }
 0x12b   : > { %v1595_v60 = vadd.f32 %v3984_v18, %v1556_v4  ;;  %2767 = vmatpush3.bf16.msra.mxu0 %v2858_v1  ;;  %2772 = vmatprep.subr.bf16.mxu1 %v3056_v0  ;;  %v2888_v1 = vld [vmem:[%s3266_s17 + $0x58] sm:$0xff] }
 0x12c   : > { %v1596_v34 = vadd.f32 %v3984_v18, %v1557_v19 }
 0x12d   : > { %v1627_v25 = vmax.f32 %v1595_v60, 0.0  ;;  %2729 = vmatmul.mubr.msk.bf16.vlgmr.msra.gmra.mxu1 %vm575_vm0, %v1878_v26 }
 0x12e   : > { %v1628_v61 = vmax.f32 %v1596_v34, 0.0  ;;  %2773 = vmatpush3.bf16.msra.mxu1 %v2282_v33  ;;  %2732 = vmatprep.mubr.msk.bf16.mxu1 %vm575_vm0, %v1879_v11  ;;  %v2883_v34 = vld [vmem:[%s3266_s17 + $0x30] sm:$0xff] }
 0x130   : > { %v1644_v2 = vpack.c.bf16 %v1628_v61, %v1627_v25  ;;  %v2884_v25 = vld [vmem:[%s3266_s17 + $0x38] sm:$0xff] }
 0x131   : > { %v1880_v61 = vpack.c.bf16 %v2884_v25, %v2883_v34 }
 0x132   : > { %2721 = vmatmul.mubr.msk.bf16.gmra.mxu0 %vm575_vm0, %v1644_v2  ;;  %v2885_v2 = vld [vmem:[%s3266_s17 + $0x40] sm:$0xff] }
 0x133   : > { %2768 = vmatprep.mubr.msk.bf16.mxu0 %vm3057_vm4, %v3056_v0  ;;  %v1881_v12 = vpack.c.bf16 %v2886_v9, %v2885_v2  ;;  %v2898_v2 = vld [vmem:[%s3266_s17 + $0xa8] sm:$0xff] }
 0x135   : > { %2733 = vmatmul.mubr.msk.bf16.gmra.mxu1 %vm575_vm0, %v1880_v61  ;;  %v2897_v61 = vld [vmem:[%s3266_s17 + $0xa0] sm:$0xff] }
 0x136   : > { %2736 = vmatprep.mubr.msk.bf16.mxu1 %vm575_vm0, %v1881_v12  ;;  %v1887_v9 = vpack.c.bf16 %v2898_v2, %v2897_v61 }
 0x15a   : > { %v2694_v22 = vpop.f32.mrf.mxu0 }
 0x15b   : > { %v4167_v44 = vadd.f32 %v2694_v22, %v4156_v5 }
 0x15c   : > { %v1750_v18 = vpop.f32.mrf.mxu0 }
 0x15d   : > { %v4162_v6 = vadd.f32 %v4156_v5, %v1750_v18  ;;  %v2129_v41 = vsel %vm2125_vm3, %v4167_v44, 0.0 }
 0x15e   : > { %v2695_v49 = vpop.f32.mrf.mxu0 }
 0x15f   : > { %v2126_v28 = vsel %vm2125_vm3, %v4162_v6, 0.0  ;;  %v4177_v59 = vadd.f32 %v2695_v49, %v4156_v5 }
 0x160   : > { %v1753_v32 = vpop.f32.mrf.mxu0 }
 0x161   : > { %v4159_v14 = vadd.f32 %v4156_v5, %v1753_v32  ;;  %v2131_v43 = vsel %vm2125_vm3, %v4177_v59, 0.0 }
 0x163   : > { %v2127_v8 = vsel %vm2125_vm3, %v4159_v14, 0.0 }
 0x164   : > { %v2128_v57 = vadd.f32 %v2127_v8, %v2126_v28 }
 0x166   : > { %v2130_v51 = vadd.f32 %v2129_v41, %v2128_v57  ;;  %v2887_v57 = vld [vmem:[%s3266_s17 + $0x50] sm:$0xff] }
 0x168   : > { %v2132_v58 = vadd.f32 %v2131_v43, %v2130_v51  ;;  %v2889_v51 = vld [vmem:[%s3266_s17 + $0x60] sm:$0xff] }
 0x16e   : > { %v2698_v47 = vpop.f32.mrf.mxu0 }
 0x16f   : > { %v4211_v45 = vadd.f32 %v2698_v47, %v4156_v5 }
 0x170   : > { %v1766_v54 = vpop.f32.mrf.mxu0 }
 0x171   : > { %v4192_v24 = vadd.f32 %v4156_v5, %v1766_v54  ;;  %v2137_v4 = vsel %vm2125_vm3, %v4211_v45, 0.0 }
 0x172   : > { %v2699_v15 = vpop.f32.mrf.mxu0 }
 0x173   : > { %v2133_v52 = vsel %vm2125_vm3, %v4192_v24, 0.0  ;;  %v4218_v19 = vadd.f32 %v2699_v15, %v4156_v5  ;;  %v1882_v15 = vpack.c.bf16 %v2888_v1, %v2887_v57  ;;  %v1888_v1 = vpack.c.bf16 %v3857_v10, %v3854_v40 }
 0x174   : > { %v1769_v39 = vpop.f32.mrf.mxu0  ;;  %v2134_v63 = vadd.f32 %v2133_v52, %v2132_v58 }
 0x175   : > { %v4196_v56 = vadd.f32 %v4156_v5, %v1769_v39  ;;  %v2139_v18 = vsel %vm2125_vm3, %v4218_v19, 0.0  ;;  %v2890_v39 = vld [vmem:[%s3266_s17 + $0x68] sm:$0xff]  ;;  %2737 = vmatmul.mubr.msk.bf16.gmra.mxu1 %vm575_vm0, %v1882_v15 }
 0x176   : > { %v1883_v46 = vpack.c.bf16 %v2890_v39, %v2889_v51 }
 0x177   : > { %v2135_v13 = vsel %vm2125_vm3, %v4196_v56, 0.0 }
 0x178   : > { %v2136_v48 = vadd.f32 %v2135_v13, %v2134_v63  ;;  %2740 = vmatprep.mubr.msk.bf16.mxu1 %vm575_vm0, %v1883_v46  ;;  %v2892_v63 = vld [vmem:[%s3266_s17 + $0x78] sm:$0xff] }
 0x179   : > { %v1884_v53 = vpack.c.bf16 %v2892_v63, %v2891_v27 }
 0x17a   : > { %v2138_v60 = vadd.f32 %v2137_v4, %v2136_v48  ;;  %v2895_v4 = vld [vmem:[%s3266_s17 + $0x90] sm:$0xff] }
 0x17c   : > { %v2140_v32 = vadd.f32 %v2139_v18, %v2138_v60  ;;  %v2896_v60 = vld [vmem:[%s3266_s17 + $0x98] sm:$0xff] }
 0x17d   : > { %2741 = vmatmul.mubr.msk.bf16.gmra.mxu1 %vm575_vm0, %v1884_v53  ;;  %v1886_v34 = vpack.c.bf16 %v2896_v60, %v2895_v4 }
 0x183   : > { %v2702_v62 = vpop.f32.mrf.mxu0 }
 0x184   : > { %v4243_v50 = vadd.f32 %v2702_v62, %v4156_v5  ;;  %v2893_v62 = vld [vmem:[%s3266_s17 + $0x80] sm:$0xff] }
 0x185   : > { %v1782_v37 = vpop.f32.mrf.mxu0  ;;  %v1885_v26 = vpack.c.bf16 %v2894_v20, %v2893_v62 }
 0x186   : > { %v4227_v49 = vadd.f32 %v4156_v5, %v1782_v37  ;;  %v2145_v43 = vsel %vm2125_vm3, %v4243_v50, 0.0 }
 0x187   : > { %v2703_v16 = vpop.f32.mrf.mxu0  ;;  %2744 = vmatprep.mubr.msk.bf16.mxu1 %vm575_vm0, %v1885_v26 }
 0x188   : > { %v2141_v54 = vsel %vm2125_vm3, %v4227_v49, 0.0  ;;  %v4250_v58 = vadd.f32 %v2703_v16, %v4156_v5  ;;  %2745 = vmatmul.mubr.msk.bf16.gmra.mxu1 %vm575_vm0, %v1886_v34 }
 0x189   : > { %v1785_v22 = vpop.f32.mrf.mxu0  ;;  %v2142_v28 = vadd.f32 %v2141_v54, %v2140_v32  ;;  %2748 = vmatprep.mubr.msk.bf16.mxu1 %vm575_vm0, %v1887_v9 }
 0x18a   : > { %v4231_v47 = vadd.f32 %v4156_v5, %v1785_v22  ;;  %v2147_v38 = vsel %vm2125_vm3, %v4250_v58, 0.0 }
 0x18c   : > { %v2143_v41 = vsel %vm2125_vm3, %v4231_v47, 0.0 }
 0x18d   : > { %v2144_v23 = vadd.f32 %v2143_v41, %v2142_v28 }
 0x18f   : > { %v2146_v52 = vadd.f32 %v2145_v43, %v2144_v23  ;;  %v1891_v23 = vpack.c.bf16 %v4020_v3, %v4016_v42  ;;  %v1892_v42 = vpack.c.bf16 %v4068_v36, %v4061_v7 }
 0x190   : > { %2749 = vmatmul.mubr.msk.bf16.gmra.mxu1 %vm575_vm0, %v1888_v1 }
 0x191   : > { %v2148_v11 = vadd.f32 %v2147_v38, %v2146_v52 }
 0x19a   : > { %v2706_v8 = vpop.f32.mrf.mxu0 }
 0x19b   : > { %v4275_v22 = vadd.f32 %v2706_v8, %v4156_v5  ;;  %v1889_v8 = vpack.c.bf16 %v3910_v31, %v3907_v17  ;;  %v1890_v31 = vpack.c.bf16 %v3965_v21, %v3962_v30 }
 0x19c   : > { %v1798_v55 = vpop.f32.mrf.mxu0 }
 0x19d   : > { %v4259_v35 = vadd.f32 %v4156_v5, %v1798_v55  ;;  %v2153_v54 = vsel %vm2125_vm3, %v4275_v22, 0.0  ;;  %2752 = vmatprep.mubr.msk.bf16.mxu1 %vm575_vm0, %v1889_v8 }
 0x19e   : > { %v2707_v29 = vpop.f32.mrf.mxu0  ;;  %2753 = vmatmul.mubr.msk.bf16.gmra.mxu1 %vm575_vm0, %v1890_v31 }
 0x19f   : > { %v2149_v48 = vsel %vm2125_vm3, %v4259_v35, 0.0  ;;  %v4282_v28 = vadd.f32 %v2707_v29, %v4156_v5  ;;  %2756 = vmatprep.mubr.msk.bf16.mxu1 %vm575_vm0, %v1891_v23 }
 0x1a0   : > { %v1801_v13 = vpop.f32.mrf.mxu0  ;;  %v2150_v16 = vadd.f32 %v2149_v48, %v2148_v11 }
 0x1a1   : > { %v4263_v37 = vadd.f32 %v4156_v5, %v1801_v13  ;;  %v2155_v41 = vsel %vm2125_vm3, %v4282_v28, 0.0 }
 0x1a3   : > { %v2151_v25 = vsel %vm2125_vm3, %v4263_v37, 0.0 }
 0x1a4   : > { %v2152_v18 = vadd.f32 %v2151_v25, %v2150_v16 }
 0x1a6   : > { %v2154_v57 = vadd.f32 %v2153_v54, %v2152_v18  ;;  %2757 = vmatmul.mubr.msk.bf16.gmra.mxu1 %vm575_vm0, %v1892_v42 }
 0x1a7   : > { %2774 = vmatprep.mubr.msk.bf16.mxu1 %vm3057_vm4, %v3056_v0 }
 0x1a8   : > { %v2156_v39 = vadd.f32 %v2155_v41, %v2154_v57 }
 0x1b1   : > { %v2710_v33 = vpop.f32.mrf.mxu0 }
 0x1b2   : > { %v4307_v43 = vadd.f32 %v2710_v33, %v4156_v5 }
 0x1b3   : > { %v1814_v12 = vpop.f32.mrf.mxu0 }
 0x1b4   : > { %v4291_v51 = vadd.f32 %v4156_v5, %v1814_v12  ;;  %v2161_v63 = vsel %vm2125_vm3, %v4307_v43, 0.0 }
 0x1b5   : > { %v2711_v32 = vpop.f32.mrf.mxu0 }
 0x1b6   : > { %v2157_v40 = vsel %vm2125_vm3, %v4291_v51, 0.0  ;;  %v4314_v30 = vadd.f32 %v2711_v32, %v4156_v5 }
 0x1b7   : > { %v1817_v15 = vpop.f32.mrf.mxu0  ;;  %v2158_v17 = vadd.f32 %v2157_v40, %v2156_v39 }
 0x1b8   : > { %v4295_v46 = vadd.f32 %v4156_v5, %v1817_v15  ;;  %4736 = vst [vmem:[#allocation19_spill] sm:$0xff] %v4314_v30  ;;  %v2163_v53 = vsel %vm2125_vm3, %v4314_v30, 0.0 }
 0x1ba   : > { %v2159_v55 = vsel %vm2125_vm3, %v4295_v46, 0.0 }
 0x1bb   : > { %v2160_v52 = vadd.f32 %v2159_v55, %v2158_v17 }
 0x1bd   : > { %v2162_v21 = vadd.f32 %v2161_v63, %v2160_v52 }
 0x1bf   : > { %v2164_v20 = vadd.f32 %v2163_v53, %v2162_v21 }
 0x1c7   : > { %v2714_v10 = vpop.f32.mrf.mxu0 }
 0x1c8   : > { %v4334_v38 = vadd.f32 %v2714_v10, %v4156_v5 }
 0x1c9   : > { %v1830_v29 = vpop.f32.mrf.mxu0 }
 0x1ca   : > { %v4321_v62 = vadd.f32 %v4156_v5, %v1830_v29  ;;  %4739 = vst [vmem:[#allocation22_spill] sm:$0xff] %v4334_v38  ;;  %v2169_v48 = vsel %vm2125_vm3, %v4334_v38, 0.0 }
 0x1cb   : > { %v2715_v27 = vpop.f32.mrf.mxu0 }
 0x1cc   : > { %4737 = vst [vmem:[#allocation20_spill] sm:$0xff] %v4321_v62  ;;  %v2165_v13 = vsel %vm2125_vm3, %v4321_v62, 0.0  ;;  %v4339_v16 = vadd.f32 %v2715_v27, %v4156_v5 }
 0x1cd   : > { %v1833_v3 = vpop.f32.mrf.mxu0  ;;  %v2166_v7 = vadd.f32 %v2165_v13, %v2164_v20 }
 0x1ce   : > { %v4325_v26 = vadd.f32 %v4156_v5, %v1833_v3  ;;  %4740 = vst [vmem:[#allocation23_spill] sm:$0xff] %v4339_v16  ;;  %v2171_v34 = vsel %vm2125_vm3, %v4339_v16, 0.0  ;;  %v2612_v16 = vld [vmem:[%s4686_s8] ss:$0 sm:$0xff] }
 0x1d0   : > { %4738 = vst [vmem:[#allocation21_spill] sm:$0xff] %v4325_v26  ;;  %v2167_v36 = vsel %vm2125_vm3, %v4325_v26, 0.0 }
 0x1d1   : > { %v2168_v11 = vadd.f32 %v2167_v36, %v2166_v7 }
 0x1d3   : > { %v2170_v4 = vadd.f32 %v2169_v48, %v2168_v11 }
 0x1d5   : > { %v2172_v61 = vadd.f32 %v2171_v34, %v2170_v4 }
 0x1de   : > { %v2718_v33 = vpop.f32.mrf.mxu0 }
 0x1df   : > { %v4354_v54 = vadd.f32 %v2718_v33, %v4156_v5 }
 0x1e0   : > { %v1846_v0 = vpop.f32.mrf.mxu0 }
 0x1e1   : > { %v4344_v25 = vadd.f32 %v4156_v5, %v1846_v0  ;;  %4743 = vst [vmem:[#allocation26_spill] sm:$0xff] %v4354_v54  ;;  %v2177_v1 = vsel %vm2125_vm3, %v4354_v54, 0.0 }
 0x1e2   : > { %v2719_v60 = vpop.f32.mrf.mxu0 }
 0x1e3   : > { %4741 = vst [vmem:[#allocation24_spill] sm:$0xff] %v4344_v25  ;;  %v2173_v12 = vsel %vm2125_vm3, %v4344_v25, 0.0  ;;  %v4359_v8 = vadd.f32 %v2719_v60, %v4156_v5  ;;  %v2330_v25 = vlaneseq }
 0x1e4   : > { %v1849_v2 = vpop.f32.mrf.mxu0  ;;  %v2174_v18 = vadd.f32 %v2173_v12, %v2172_v61 }
 0x1e5   : > { %v4347_v9 = vadd.f32 %v4156_v5, %v1849_v2  ;;  %4744 = vst [vmem:[#allocation27_spill] sm:$0xff] %v4359_v8  ;;  %v2179_v39 = vsel %vm2125_vm3, %v4359_v8, 0.0  ;;  %v2331_v38 = vshrl.u32 %v2330_v25, 7 }
 0x1e7   : > { %4742 = vst [vmem:[#allocation25_spill] sm:$0xff] %v4347_v9  ;;  %v2175_v32 = vsel %vm2125_vm3, %v4347_v9, 0.0 }
 0x1e8   : > { %v2176_v57 = vadd.f32 %v2175_v32, %v2174_v18 }
 0x1ea   : > { %v2178_v15 = vadd.f32 %v2177_v1, %v2176_v57 }
 0x1ec   : > { %v2180_v10 = vadd.f32 %v2179_v39, %v2178_v15 }
 0x1ed   : > { %v2730_v32 = vpop.f32.mrf.mxu1 }
 0x1ee   : > { %v4387_v26 = vadd.f32 %v2730_v32, %v2612_v16 }
 0x1ef   : > { %v1998_v57 = vpop.f32.mrf.mxu1 }
 0x1f0   : > { %v4389_v62 = vadd.f32 %v2612_v16, %v1998_v57 }
 0x1f1   : > { %v2731_v1 = vpop.f32.mrf.mxu1 }
 0x1f2   : > { %v2722_v41 = vpop.f32.mrf.mxu0  ;;  %v4391_v30 = vadd.f32 %v2731_v1, %v2612_v16  ;;  %v2332_v1 = vsub.s32 0, %v2331_v38 }
 0x1f3   : > { %v4369_v52 = vadd.f32 %v2722_v41, %v4156_v5  ;;  %v2001_v15 = vpop.f32.mrf.mxu1 }
 0x1f4   : > { %v1862_v40 = vpop.f32.mrf.mxu0 }
 0x1f5   : > { %v4364_v17 = vadd.f32 %v4156_v5, %v1862_v40  ;;  %4746 = vst [vmem:[#allocation29_spill] sm:$0xff] %v4369_v52  ;;  %v2185_v3 = vsel %vm2125_vm3, %v4369_v52, 0.0  ;;  %v2734_v41 = vpop.f32.mrf.mxu1 }
 0x1f6   : > { %v2723_v31 = vpop.f32.mrf.mxu0 }
 0x1f7   : > { %4745 = vst [vmem:[#allocation28_spill] sm:$0xff] %v4364_v17  ;;  %v2181_v55 = vsel %vm2125_vm3, %v4364_v17, 0.0  ;;  %v4375_v63 = vadd.f32 %v2723_v31, %v4156_v5  ;;  %v2014_v39 = vpop.f32.mrf.mxu1 }
 0x1f8   : > { %v2182_v23 = vadd.f32 %v2181_v55, %v2180_v10  ;;  %v1865_v29 = vpop.f32.mrf.mxu0 }
 0x1f9   : > { %v4372_v27 = vadd.f32 %v4156_v5, %v1865_v29  ;;  %4748 = vst [vmem:[#allocation31_spill] sm:$0xff] %v4375_v63  ;;  %v2187_v20 = vsel %vm2125_vm3, %v4375_v63, 0.0  ;;  %v2735_v40 = vpop.f32.mrf.mxu1 }
 0x1fb   : > { %4747 = vst [vmem:[#allocation30_spill] sm:$0xff] %v4372_v27  ;;  %v2183_v21 = vsel %vm2125_vm3, %v4372_v27, 0.0  ;;  %v2017_v10 = vpop.f32.mrf.mxu1 }
 0x1fc   : > { %v2184_v42 = vadd.f32 %v2183_v21, %v2182_v23 }
 0x1fe   : > { %v2186_v53 = vadd.f32 %v2185_v3, %v2184_v42 }
 0x200   : > { %v2188_v13 = vadd.f32 %v2187_v20, %v2186_v53 }
 0x202   : > { %v2189_v7 = vrot.slane %v2188_v13, 4 }
 0x204   : > { %v2190_v36 = vadd.f32 %v2189_v7, %v2188_v13 }
 0x206   : > { %v2191_v11 = vrot.slane %v2190_v36, 2 }
 0x208   : > { %v2192_v33 = vadd.f32 %v2191_v11, %v2190_v36 }
 0x20a   : > { %v2193_v48 = vrot.slane %v2192_v33, 1 }
 0x20c   : > { %v2194_v4 = vadd.f32 %v2193_v48, %v2192_v33 }
 0x20e   : > { %v2196_v5 = vmul.f32 0.00390625, %v2194_v4 }
 0x210   : > { %v2197_v0 = vpack.c.bf16 %v2196_v5, %v2196_v5 }
 0x212   : > { %2769 = vmatmul.mubr.msk.bf16.vlgmr.msra.gmra.mxu0 %vm2125_vm3, %v2197_v0 }
 0x235   : > { %v2738_v31 = vpop.f32.mrf.mxu1 }
 0x237   : > { %v2030_v55 = vpop.f32.mrf.mxu1 }
 0x239   : > { %v2739_v23 = vpop.f32.mrf.mxu1 }
 0x23a   : > { %v4407_v25 = vadd.f32 %v2739_v23, %v2612_v16 }
 0x23b   : > { %v2033_v29 = vpop.f32.mrf.mxu1 }
 0x23c   : > { %v4409_v32 = vadd.f32 %v2612_v16, %v2033_v29 }
 0x23d   : > { %v2742_v21 = vpop.f32.mrf.mxu1 }
 0x23e   : > { %v4411_v57 = vadd.f32 %v2742_v21, %v2612_v16 }
 0x23f   : > { %v2046_v42 = vpop.f32.mrf.mxu1 }
 0x241   : > { %v2743_v3 = vpop.f32.mrf.mxu1 }
 0x243   : > { %v2049_v53 = vpop.f32.mrf.mxu1 }
 0x248   : > { %v2746_v20 = vpop.f32.mrf.mxu1 }
 0x24a   : > { %v2062_v13 = vpop.f32.mrf.mxu1 }
 0x24c   : > { %v2747_v7 = vpop.f32.mrf.mxu1 }
 0x24e   : > { %v2065_v36 = vpop.f32.mrf.mxu1 }
 0x250   : > { %v2750_v11 = vpop.f32.mrf.mxu1 }
 0x251   : > { %v4427_v23 = vadd.f32 %v2750_v11, %v2612_v16 }
 0x252   : > { %v2078_v33 = vpop.f32.mrf.mxu1 }
 0x253   : > { %4749 = vst [vmem:[#allocation32_spill] sm:$0xff] %v4427_v23  ;;  %v4429_v21 = vadd.f32 %v2612_v16, %v2078_v33 }
 0x254   : > { %v2751_v48 = vpop.f32.mrf.mxu1 }
 0x255   : > { %4750 = vst [vmem:[#allocation33_spill] sm:$0xff] %v4429_v21  ;;  %v4431_v38 = vadd.f32 %v2751_v48, %v2612_v16  ;;  %v4772_v21 = vld [vmem:[#allocation31_spill] sm:$0xff] }
 0x256   : > { %v2081_v4 = vpop.f32.mrf.mxu1 }
 0x257   : > { %4751 = vst [vmem:[#allocation34_spill] sm:$0xff] %v4431_v38  ;;  %v4770_v38 = vld [vmem:[#allocation30_spill] sm:$0xff] }
 0x25e   : > { %v2754_v5 = vpop.f32.mrf.mxu1 }
 0x260   : > { %v2094_v0 = vpop.f32.mrf.mxu1 }
 0x2d2   : > { %v2267_v60 = vpop.f32.mrf.mxu0 }
 0x2d3   : > { %v2273_v34 = vmax.f32 %v2267_v60, 0.0  ;;  %v2755_v60 = vpop.f32.mrf.mxu1 }
 0x2d4   : > { %v2770_v61 = vpop.f32.mrf.mxu0 }
 0x2d5   : > { %v2274_v2 = vpack.c.bf16 %v2273_v34, %v2273_v34  ;;  %v2097_v34 = vpop.f32.mrf.mxu1 }
 0x2d6   : > { %v2270_v12 = vpop.f32.mrf.mxu0 }
 0x2d7   : > { %2775 = vmatmul.mubr.msk.bf16.vlgmr.msra.gmra.mxu1 %vm2276_vm6, %v2274_v2  ;;  %v2758_v61 = vpop.f32.mrf.mxu1 }
 0x2d8   : > { %v2771_v18 = vpop.f32.mrf.mxu0 }
 0x2d9   : > { %v2110_v2 = vpop.f32.mrf.mxu1 }
 0x2da   : > { %v4445_v11 = vadd.f32 %v2612_v16, %v2110_v2 }
 0x2db   : > { %v2759_v12 = vpop.f32.mrf.mxu1 }
 0x2dc   : > { %4758 = vst [vmem:[#allocation41_spill] sm:$0xff] %v4445_v11  ;;  %v4447_v23 = vadd.f32 %v2759_v12, %v2612_v16  ;;  %v4765_v11 = vld [vmem:[#allocation24_spill] sm:$0xff] }
 0x2dd   : > { %v2113_v18 = vpop.f32.mrf.mxu1 }
 0x2de   : > { %4759 = vst [vmem:[#allocation42_spill] sm:$0xff] %v4447_v23  ;;  %v2114_v33 = vadd.f32 %v2612_v16, %v2113_v18  ;;  %v4760_v18 = vld [vmem:[#allocation19_spill] sm:$0xff]  ;;  %v4763_v23 = vld [vmem:[#allocation22_spill] sm:$0xff] }
 0x397   : > { %v2318_v63 = vpop.f32.mrf.mxu1 }
 0x398   : > { %v2637_v52 = vmul.f32 -1.442695, %v2318_v63  ;;  %v4393_v63 = vadd.f32 %v2612_v16, %v2001_v15  ;;  %v4413_v15 = vadd.f32 %v2612_v16, %v2046_v42  ;;  %v4433_v42 = vadd.f32 %v2612_v16, %v2081_v4 }
 0x399   : > { %v2776_v27 = vpop.f32.mrf.mxu1 }
 0x39a   : > { %2861 = vpow2.f32 %v2637_v52  ;;  %v4395_v52 = vadd.f32 %v2734_v41, %v2612_v16  ;;  %v4405_v27 = vadd.f32 %v2612_v16, %v2030_v55  ;;  %v4415_v41 = vadd.f32 %v2743_v3, %v2612_v16  ;;  %4752 = vst [vmem:[#allocation35_spill] sm:$0xff] %v4433_v42  ;;  %v4771_v42 = vld [vmem:[#allocation29_spill] sm:$0xff] }
 0x39b   : > { %v2321_v17 = vpop.f32.mrf.mxu1  ;;  %v4425_v55 = vadd.f32 %v2612_v16, %v2065_v36  ;;  %v4435_v3 = vadd.f32 %v2754_v5, %v2612_v16  ;;  %v4443_v36 = vadd.f32 %v2758_v61, %v2612_v16 }
 0x39c   : > { %v4403_v17 = vadd.f32 %v2738_v31, %v2612_v16  ;;  %v4423_v31 = vadd.f32 %v2747_v7, %v2612_v16 }
 0x39d   : > { %v2777_v8 = vpop.f32.mrf.mxu1  ;;  %4753 = vst [vmem:[#allocation36_spill] sm:$0xff] %v4435_v3  ;;  %4757 = vst [vmem:[#allocation40_spill] sm:$0xff] %v4443_v36  ;;  %v4764_v36 = vld [vmem:[#allocation23_spill] sm:$0xff]  ;;  %v4767_v3 = vld [vmem:[#allocation26_spill] sm:$0xff] }
 0x39e   : > { %v4397_v8 = vadd.f32 %v2612_v16, %v2014_v39  ;;  %v4417_v39 = vadd.f32 %v2612_v16, %v2049_v53  ;;  %v4437_v53 = vadd.f32 %v2612_v16, %v2094_v0 }
 0x3a0   : > { %4754 = vst [vmem:[#allocation37_spill] sm:$0xff] %v4437_v53  ;;  %v4769_v53 = vld [vmem:[#allocation28_spill] sm:$0xff] }
 0x3a7   : > { %v2862_v54 = vpop.eup %2861 }
 0x3a8   : > { %v2327_v9 = vadd.f32 1.0, %v2862_v54  ;;  %v4399_v54 = vadd.f32 %v2735_v40, %v2612_v16  ;;  %v4419_v40 = vadd.f32 %v2746_v20, %v2612_v16  ;;  %v4439_v20 = vadd.f32 %v2755_v60, %v2612_v16 }
 0x3aa   : > { %2863 = vrcp.f32 %v2327_v9  ;;  %v4401_v9 = vadd.f32 %v2612_v16, %v2017_v10  ;;  %v4421_v10 = vadd.f32 %v2612_v16, %v2062_v13  ;;  %4755 = vst [vmem:[#allocation38_spill] sm:$0xff] %v4439_v20  ;;  %v4441_v13 = vadd.f32 %v2612_v16, %v2097_v34  ;;  %v4766_v20 = vld [vmem:[#allocation25_spill] sm:$0xff] }
 0x3ac   : > { %4756 = vst [vmem:[#allocation39_spill] sm:$0xff] %v4441_v13  ;;  %v4768_v13 = vld [vmem:[#allocation27_spill] sm:$0xff] }
 0x3b7   : > { %v2864_v29 = vpop.eup %2863 }
 0x3b8   : > { %v2333_v7 = vrot.slane %v2864_v29, %v2332_v1  ;;  %v4761_v1 = vld [vmem:[#allocation20_spill] sm:$0xff]  ;;  %v4762_v29 = vld [vmem:[#allocation21_spill] sm:$0xff] }
 0x3ba   : > { %v2334_v48 = vmul.f32 %v2333_v7, %v4162_v6  ;;  %v2335_v4 = vmul.f32 %v2333_v7, %v4159_v14  ;;  %v2336_v5 = vmul.f32 %v2333_v7, %v4167_v44  ;;  %v2337_v0 = vmul.f32 %v2333_v7, %v4177_v59 }
 0x3bb   : > { %v2338_v60 = vmul.f32 %v2333_v7, %v4192_v24  ;;  %v2339_v34 = vmul.f32 %v2333_v7, %v4196_v56  ;;  %v2340_v61 = vmul.f32 %v2333_v7, %v4211_v45  ;;  %v2341_v2 = vmul.f32 %v2333_v7, %v4218_v19 }
 0x3bc   : > { %v2342_v12 = vmul.f32 %v2333_v7, %v4227_v49  ;;  %v2343_v16 = vmul.f32 %v2333_v7, %v4231_v47  ;;  %v2344_v6 = vmul.f32 %v2333_v7, %v4243_v50  ;;  %v2345_v14 = vmul.f32 %v2333_v7, %v4250_v58 }
 0x3bd   : > { %v2346_v44 = vmul.f32 %v2333_v7, %v4259_v35  ;;  %v2347_v59 = vmul.f32 %v2333_v7, %v4263_v37  ;;  %v2348_v24 = vmul.f32 %v2333_v7, %v4275_v22  ;;  %v2349_v56 = vmul.f32 %v2333_v7, %v4282_v28 }
 0x3be   : > { %v2350_v45 = vmul.f32 %v2333_v7, %v4291_v51  ;;  %v2351_v19 = vmul.f32 %v2333_v7, %v4295_v46  ;;  %v2352_v49 = vmul.f32 %v2333_v7, %v4307_v43  ;;  %v2353_v47 = vmul.f32 %v2333_v7, %v4760_v18 }
 0x3bf   : > { %v2354_v50 = vmul.f32 %v2333_v7, %v4761_v1  ;;  %v2355_v58 = vmul.f32 %v2333_v7, %v4762_v29  ;;  %v2356_v35 = vmul.f32 %v2333_v7, %v4763_v23  ;;  %v2357_v37 = vmul.f32 %v2333_v7, %v4764_v36 }
 0x3c0   : > { %v2358_v22 = vmul.f32 %v2333_v7, %v4765_v11  ;;  %v2359_v28 = vmul.f32 %v2333_v7, %v4766_v20  ;;  %v2360_v51 = vmul.f32 %v2333_v7, %v4767_v3  ;;  %v2361_v46 = vmul.f32 %v2333_v7, %v4768_v13 }
 0x3c1   : > { %v2362_v43 = vmul.f32 %v2333_v7, %v4769_v53  ;;  %v2363_v18 = vmul.f32 %v2333_v7, %v4770_v38  ;;  %v2364_v1 = vmul.f32 %v2333_v7, %v4771_v42  ;;  %v2365_v29 = vmul.f32 %v2333_v7, %v4772_v21 }
 0x3c2   : > { %v2366_v23 = vadd.f32 %v2334_v48, %v4389_v62  ;;  %v2367_v36 = vadd.f32 %v2335_v4, %v4393_v63  ;;  %v2368_v11 = vadd.f32 %v2336_v5, %v4387_v26  ;;  %v2369_v20 = vadd.f32 %v2337_v0, %v4391_v30  ;;  %v4780_v0 = vld [vmem:[#allocation38_spill] sm:$0xff] }
 0x3c3   : > { %v2370_v3 = vadd.f32 %v2338_v60, %v4397_v8  ;;  %v2371_v13 = vadd.f32 %v2339_v34, %v4401_v9  ;;  %v2372_v53 = vadd.f32 %v2340_v61, %v4395_v52  ;;  %v2373_v38 = vadd.f32 %v2341_v2, %v4399_v54  ;;  %v4781_v34 = vld [vmem:[#allocation41_spill] sm:$0xff] }
 0x3c4   : > { %v2374_v42 = vadd.f32 %v2342_v12, %v4405_v27  ;;  %v2375_v21 = vadd.f32 %v2343_v16, %v4409_v32  ;;  %v2376_v62 = vadd.f32 %v2344_v6, %v4403_v17  ;;  %v2377_v63 = vadd.f32 %v2345_v14, %v4407_v25  ;;  %v4773_v25 = vld [vmem:[#allocation33_spill] sm:$0xff]  ;;  %v4782_v12 = vld [vmem:[#allocation40_spill] sm:$0xff]  ;;  %v4783_v6 = vld [vmem:[#allocation42_spill] sm:$0xff] }
 0x3c5   : > { %v2378_v26 = vadd.f32 %v2346_v44, %v4413_v15  ;;  %v2379_v30 = vadd.f32 %v2347_v59, %v4417_v39  ;;  %v2380_v8 = vadd.f32 %v2348_v24, %v4411_v57  ;;  %v2381_v9 = vadd.f32 %v2349_v56, %v4415_v41  ;;  %v4774_v15 = vld [vmem:[#allocation35_spill] sm:$0xff]  ;;  %v4775_v57 = vld [vmem:[#allocation32_spill] sm:$0xff] }
 0x3c6   : > { %v4498_v52 = vadd.f32 %v2350_v45, %v4421_v10  ;;  %v4501_v54 = vadd.f32 %v2351_v19, %v4425_v55  ;;  %v4504_v27 = vadd.f32 %v2352_v49, %v4419_v40  ;;  %v4507_v17 = vadd.f32 %v2353_v47, %v4423_v31  ;;  %v4776_v10 = vld [vmem:[#allocation34_spill] sm:$0xff]  ;;  %v4777_v55 = vld [vmem:[#allocation37_spill] sm:$0xff]  ;;  %v4778_v40 = vld [vmem:[#allocation39_spill] sm:$0xff] }
 0x3c7   : > { %v4510_v32 = vadd.f32 %v2354_v50, %v4773_v25  ;;  %v4513_v39 = vadd.f32 %v2355_v58, %v4774_v15  ;;  %v4516_v41 = vadd.f32 %v2356_v35, %v4775_v57  ;;  %v4519_v7 = vadd.f32 %v2357_v37, %v4776_v10  ;;  %v4779_v31 = vld [vmem:[#allocation36_spill] sm:$0xff] }
 0x3c8   : > { %v4522_v48 = vadd.f32 %v2358_v22, %v4777_v55  ;;  %v4525_v4 = vadd.f32 %v2359_v28, %v4778_v40  ;;  %v4528_v5 = vadd.f32 %v2360_v51, %v4779_v31  ;;  %v4531_v60 = vadd.f32 %v2361_v46, %v4780_v0 }
 0x3c9   : > { %v4534_v61 = vadd.f32 %v2362_v43, %v4781_v34  ;;  %v4536_v2 = vadd.f32 %v2363_v18, %v2114_v33  ;;  %v4539_v16 = vadd.f32 %v2364_v1, %v4782_v12  ;;  %v4542_v14 = vadd.f32 %v2365_v29, %v4783_v6 }
 0x3ca   : > { %v2398_v44 = vmax.f32 %v2366_v23, 0.0  ;;  %v2399_v59 = vmax.f32 %v2367_v36, 0.0  ;;  %v2400_v24 = vmax.f32 %v2368_v11, 0.0  ;;  %v2401_v56 = vmax.f32 %v2369_v20, 0.0 }
 0x3cb   : > { %v2402_v45 = vmax.f32 %v2370_v3, 0.0  ;;  %v2403_v19 = vmax.f32 %v2371_v13, 0.0  ;;  %v2404_v49 = vmax.f32 %v2372_v53, 0.0  ;;  %v2405_v47 = vmax.f32 %v2373_v38, 0.0 }
 0x3cc   : > { %v2406_v50 = vmax.f32 %v2374_v42, 0.0  ;;  %v2407_v58 = vmax.f32 %v2375_v21, 0.0  ;;  %v2408_v35 = vmax.f32 %v2376_v62, 0.0  ;;  %v2409_v33 = vmax.f32 %v2377_v63, 0.0  ;;  %2430 = vst.msk [vmem:[%s4546_s13] sm:$0xff] %vm2125_vm3, %v2398_v44  ;;  %2431 = vst.msk [vmem:[%s4546_s13 + $0x8] sm:$0xff] %vm2125_vm3, %v2399_v59 }
 0x3cd   : > { %2432 = vst.msk [vmem:[%s4546_s13 + $0x10] sm:$0xff] %vm2125_vm3, %v2400_v24  ;;  %2433 = vst.msk [vmem:[%s4546_s13 + $0x18] sm:$0xff] %vm2125_vm3, %v2401_v56  ;;  %v2410_v37 = vmax.f32 %v2378_v26, 0.0  ;;  %v2411_v22 = vmax.f32 %v2379_v30, 0.0  ;;  %v2412_v28 = vmax.f32 %v2380_v8, 0.0  ;;  %v2413_v51 = vmax.f32 %v2381_v9, 0.0 }
 0x3ce   : > { %2434 = vst.msk [vmem:[%s4546_s13 + $0x20] sm:$0xff] %vm2125_vm3, %v2402_v45  ;;  %2435 = vst.msk [vmem:[%s4546_s13 + $0x28] sm:$0xff] %vm2125_vm3, %v2403_v19  ;;  %v2414_v46 = vmax.f32 %v4498_v52, 0.0  ;;  %v2415_v43 = vmax.f32 %v4501_v54, 0.0  ;;  %v2416_v18 = vmax.f32 %v4504_v27, 0.0  ;;  %v2417_v1 = vmax.f32 %v4507_v17, 0.0 }
 0x3cf   : > { %2436 = vst.msk [vmem:[%s4546_s13 + $0x30] sm:$0xff] %vm2125_vm3, %v2404_v49  ;;  %2437 = vst.msk [vmem:[%s4546_s13 + $0x38] sm:$0xff] %vm2125_vm3, %v2405_v47  ;;  %v2418_v29 = vmax.f32 %v4510_v32, 0.0  ;;  %v2419_v23 = vmax.f32 %v4513_v39, 0.0  ;;  %v2420_v36 = vmax.f32 %v4516_v41, 0.0  ;;  %v2421_v11 = vmax.f32 %v4519_v7, 0.0 }
 0x3d0   : > { %2438 = vst.msk [vmem:[%s4546_s13 + $0x40] sm:$0xff] %vm2125_vm3, %v2406_v50  ;;  %2439 = vst.msk [vmem:[%s4546_s13 + $0x48] sm:$0xff] %vm2125_vm3, %v2407_v58  ;;  %v2422_v20 = vmax.f32 %v4522_v48, 0.0  ;;  %v2423_v3 = vmax.f32 %v4525_v4, 0.0  ;;  %v2424_v13 = vmax.f32 %v4528_v5, 0.0  ;;  %v2425_v53 = vmax.f32 %v4531_v60, 0.0 }
 0x3d1   : > { %2440 = vst.msk [vmem:[%s4546_s13 + $0x50] sm:$0xff] %vm2125_vm3, %v2408_v35  ;;  %2441 = vst.msk [vmem:[%s4546_s13 + $0x58] sm:$0xff] %vm2125_vm3, %v2409_v33  ;;  %v2426_v38 = vmax.f32 %v4534_v61, 0.0  ;;  %v2427_v42 = vmax.f32 %v4536_v2, 0.0  ;;  %v2428_v21 = vmax.f32 %v4539_v16, 0.0  ;;  %v2429_v62 = vmax.f32 %v4542_v14, 0.0 }
 0x3d2   : > { %2442 = vst.msk [vmem:[%s4546_s13 + $0x60] sm:$0xff] %vm2125_vm3, %v2410_v37  ;;  %2443 = vst.msk [vmem:[%s4546_s13 + $0x68] sm:$0xff] %vm2125_vm3, %v2411_v22 }
 0x3d3   : > { %2444 = vst.msk [vmem:[%s4546_s13 + $0x70] sm:$0xff] %vm2125_vm3, %v2412_v28  ;;  %2445 = vst.msk [vmem:[%s4546_s13 + $0x78] sm:$0xff] %vm2125_vm3, %v2413_v51 }
 0x3d4   : > { %2446 = vst.msk [vmem:[%s4546_s13 + $0x80] sm:$0xff] %vm2125_vm3, %v2414_v46  ;;  %2447 = vst.msk [vmem:[%s4546_s13 + $0x88] sm:$0xff] %vm2125_vm3, %v2415_v43 }
 0x3d5   : > { %2448 = vst.msk [vmem:[%s4546_s13 + $0x90] sm:$0xff] %vm2125_vm3, %v2416_v18  ;;  %2449 = vst.msk [vmem:[%s4546_s13 + $0x98] sm:$0xff] %vm2125_vm3, %v2417_v1 }
 0x3d6   : > { %2450 = vst.msk [vmem:[%s4546_s13 + $0xa0] sm:$0xff] %vm2125_vm3, %v2418_v29  ;;  %2451 = vst.msk [vmem:[%s4546_s13 + $0xa8] sm:$0xff] %vm2125_vm3, %v2419_v23 }
 0x3d7   : > { %2452 = vst.msk [vmem:[%s4546_s13 + $0xb0] sm:$0xff] %vm2125_vm3, %v2420_v36  ;;  %2453 = vst.msk [vmem:[%s4546_s13 + $0xb8] sm:$0xff] %vm2125_vm3, %v2421_v11 }
 0x3d8   : > { %2454 = vst.msk [vmem:[%s4546_s13 + $0xc0] sm:$0xff] %vm2125_vm3, %v2422_v20  ;;  %2455 = vst.msk [vmem:[%s4546_s13 + $0xc8] sm:$0xff] %vm2125_vm3, %v2423_v3 }
 0x3d9   : > { %2456 = vst.msk [vmem:[%s4546_s13 + $0xd0] sm:$0xff] %vm2125_vm3, %v2424_v13  ;;  %2457 = vst.msk [vmem:[%s4546_s13 + $0xd8] sm:$0xff] %vm2125_vm3, %v2425_v53 }
 0x3da   : > { %2458 = vst.msk [vmem:[%s4546_s13 + $0xe0] sm:$0xff] %vm2125_vm3, %v2426_v38  ;;  %2459 = vst.msk [vmem:[%s4546_s13 + $0xe8] sm:$0xff] %vm2125_vm3, %v2427_v42 }
 0x3db   : > { %2460 = vst.msk [vmem:[%s4546_s13 + $0xf0] sm:$0xff] %vm2125_vm3, %v2428_v21  ;;  %2461 = vst.msk [vmem:[%s4546_s13 + $0xf8] sm:$0xff] %vm2125_vm3, %v2429_v62 }
 0x3dc   : > { %2992 = shalt.err (!%p2989_p0)
}
 0x3dd   : > { %s2993_s14 = scalar_lea.hbm %s4605_s12, 4096  ;;  %s2997_s17 = scalar_lea.hbm %s4784_s29, 8192 }
 0x3de   : > { %p2994_p8 = scmp.ne.s32.totalorder %s4605_s12, %s2993_s14  ;;  %p2998_p6 = scmp.lt.s32.totalorder %s4605_s12, %s4784_s29 }
 0x3df   : > { %p2999_p11 = scmp.lt.s32.totalorder %s2997_s17, %s2993_s14 }
 0x3e0   : > { %p2995_p4 = pnand %p2994_p8, %p4786_p5 }
 0x3e1   : > { %p3000_p13 = por %p2999_p11, %p2998_p6 }
 0x3e2   : > { %p2996_p7 = pneg %p2995_p4 }
 0x3e4   : > { %p3001_p3 = pnand %p3000_p13, %p2996_p7 }
 0x3e6   : > { %3004 = shalt.err (!%p3001_p3)
}
 0x3e7   : > { %s3059_s24 = smov 128   ;;  %s3060_s21 = smov 8  }
 0x3e8   : > { %2788 = dma.vmem_to_hbm [thread:$0]  (%p4786_p5), %s4607_s11, 4096, %s4605_s12, %s2463_s23, %s3059_s24, %s3059_s24, %s3060_s21  }
 0x3e9 PF: > { %s4787_s28 = sld [smem:[#allocation13_spill]]  ;;  %p4790_p12 = scmp.ge.s32.totalorder %s3047_s20, 2 }
 0x3ea   : > { %s4788_s19 = sld [smem:[#allocation18_spill]] }
 0x3ef   : > { %s2491_s30 = sand.u32 1, %s4787_s28  }
 0x3f0   : > { %p4789_p1 = scmp.ne.s32.totalorder %s4788_s19, 0  ;;  %s2492_s2 = scalar_lea.sflag [#allocation5], %s2491_s30 }
 0x3f2   : > { %p2802_p9 = pnand %p4790_p12, %p4789_p1 }
 0x3f4   : > { %p2803_p10 = pneg %p2802_p9 }
 0x3f6   : > { %3030 = dma.done.wait (%p2803_p10), %s2492_s2, 4096  }
 0x3f7   : > { %3032 = vsyncadd (%p2803_p10), %s2492_s2, 4294963200  ;;  %s4791_s20 = sld [smem:[#allocation15_spill]]  ;;  %s4794_s17 = smov %s3039_s18 }
 0x3f8   : > { %s4792_s26 = sld [smem:[#allocation14_spill]] }
 0x3f9   : > { %s4793_s19 = sld [smem:[#allocation16_spill]] }
 0x3fd   : > { %p25_p2 = scmp.ge.s32.totalorder %s4791_s20, 4  }
 0x3fe   : > { %s4795_s18 = smov %s4792_s26 }
 0x3ff   :  { %27 = sbr.rel (!%p25_p2) target bundleno = 9 (0x9), region = 128 }
 0x404   :  { %2497 = vsyncpa [#allocation4], 1 }
 0x405   :  { %2499 = vsyncpa [#allocation4 + $0x1], 1 }
 0x406   :  { %2500 = vsyncpa [#allocation7], 1 }
 0x407   :  { %2501 = vsyncpa [#allocation5], 1 }
 0x408   :  { %2503 = vsyncpa [#allocation5 + $0x1], 1 }

</bundles_post_ra>
